<compile_context>
chip_gen: v7x
topology: tpu7x:2x2x1
jax: 0.10.0
libtpu: 0.0.40
codegen_flags: <defaults>
</compile_context>

<pallas_src>
import functools

import jax
import jax.numpy as jnp
from jax import lax
from jax.experimental import pallas as pl
from jax.experimental.pallas import tpu as pltpu


# ---------------------------------------------------------------------------
# Fused kernel: all layers, one time-chunk per grid step
# ---------------------------------------------------------------------------
def _res_rnn_kernel(x_ref, h0_ref, wih_ref, whh_ref, b_ref,      # inputs
                    y_ref, hlast_ref,                            # outputs
                    h_state, cur_buf, pre_buf,                   # VMEM scratch
                    *, nlayers, time_chunk, batch):
    c = pl.program_id(0)

    # Initialize the carried per-layer hidden state on the first chunk only.
    @pl.when(c == 0)
    def _():
        h_state[...] = h0_ref[...].astype(jnp.float32)

    # Load the whole (TT*B, D) chunk once; work in f32.
    cur_buf[...] = x_ref[0].astype(jnp.float32)

    for l in range(nlayers):
        # Hoisted, time-independent input projection + fused bias for the whole chunk:
        # one big (TT*B, D) x (D, H) MXU matmul instead of TT tiny per-step ones.
        pre_buf[...] = (
            jnp.dot(cur_buf[...], wih_ref[l],
                    preferred_element_type=jnp.float32)
            + b_ref[l])

        whh = whh_ref[l]                       # (H, H), loop-invariant

        def step(t, h_prev, _whh=whh):
            r0 = pl.multiple_of(t * batch, batch)
            rows = pl.ds(r0, batch)
            h_new = jnp.tanh(
                pre_buf[rows, :]
                + jnp.dot(h_prev, _whh, preferred_element_type=jnp.float32))
            # Residual: this layer's output (= next layer's input) is h_t + x_t, in place.
            cur_buf[rows, :] = cur_buf[rows, :] + h_new
            return h_new

        h_last = lax.fori_loop(0, time_chunk, step, h_state[l], unroll=True)
        h_state[l] = h_last

    # One large lane-dense store per chunk.
    y_ref[0] = cur_buf[...].astype(y_ref.dtype)

    # Final hidden state: resident output block, write only on the last chunk.
    @pl.when(c == pl.num_programs(0) - 1)
    def _():
        hlast_ref[...] = h_state[...].astype(hlast_ref.dtype)


def _pick_time_chunk(T, cap=32):
    tt = min(T, cap)
    while T % tt:
        tt -= 1
    return tt


# ---------------------------------------------------------------------------
# ResRNNBase.forward_one equivalent (dropout = identity / eval mode)
# ---------------------------------------------------------------------------
def res_rnn_forward(emb, init_hidden_list, params, *, time_chunk=None):
    """
    emb: (T, B, D); init_hidden_list: list of L arrays (1, B, H);
    params: list of L dicts with w_ih (H, D), w_hh (H, H), b_ih (H,), b_hh (H,).
    Returns (rnn_out (T, B, H), hidden_list: list of (1, B, H)).
    """
    T, B, D = emb.shape
    L = len(params)
    assert L == len(init_hidden_list)
    H = params[0]["w_hh"].shape[0]
    # Residual connection requires ninp == nhid — fail loudly otherwise.
    assert D == H, f"residual RNN requires ninp == nhid, got ninp={D}, nhid={H}"

    TT = time_chunk if time_chunk is not None else _pick_time_chunk(T)
    assert T % TT == 0, f"time_chunk {TT} must divide T={T}"
    n_chunks = T // TT

    dtype = emb.dtype
    # Pre-transpose weights so the kernel does plain row-major MXU matmuls;
    # fold b_ih + b_hh into a single bias added once per chunk matmul.
    wih = jnp.stack([jnp.asarray(p["w_ih"], dtype).T for p in params])           # (L, D, H)
    whh = jnp.stack([jnp.asarray(p["w_hh"], dtype).T for p in params])           # (L, H, H)
    bias = jnp.stack([(jnp.asarray(p["b_ih"], jnp.float32)
                       + jnp.asarray(p["b_hh"], jnp.float32)).reshape(1, H)
                      for p in params])                                           # (L, 1, H)
    h0 = jnp.concatenate([jnp.asarray(h, dtype) for h in init_hidden_list], 0)    # (L, B, H)

    # Time-chunked, row-flattened view: each grid step owns a (TT*B, D) slab.
    x = emb.reshape(n_chunks, TT * B, D)

    kernel = functools.partial(_res_rnn_kernel,
                               nlayers=L, time_chunk=TT, batch=B)

    grid_spec = pltpu.PrefetchScalarGridSpec(
        num_scalar_prefetch=0,
        grid=(n_chunks,),
        in_specs=[
            pl.BlockSpec((1, TT * B, D), lambda c: (c, 0, 0)),   # x chunk
            pl.BlockSpec((L, B, H), lambda c: (0, 0, 0)),        # h0        (resident)
            pl.BlockSpec((L, D, H), lambda c: (0, 0, 0)),        # W_ih^T    (resident)
            pl.BlockSpec((L, H, H), lambda c: (0, 0, 0)),        # W_hh^T    (resident)
            pl.BlockSpec((L, 1, H), lambda c: (0, 0, 0)),        # bias      (resident)
        ],
        out_specs=[
            pl.BlockSpec((1, TT * B, H), lambda c: (c, 0, 0)),   # y chunk
            pl.BlockSpec((L, B, H), lambda c: (0, 0, 0)),        # h_last    (resident)
        ],
        scratch_shapes=[
            pltpu.VMEM((L, B, H), jnp.float32),     # carried hidden state (per layer)
            pltpu.VMEM((TT * B, H), jnp.float32),   # current layer activations (chunk)
            pltpu.VMEM((TT * B, H), jnp.float32),   # hoisted x @ W_ih^T + b (chunk)
        ],
    )

    y, h_last = pl.pallas_call(
        kernel,
        out_shape=(jax.ShapeDtypeStruct((n_chunks, TT * B, H), dtype),
                   jax.ShapeDtypeStruct((L, B, H), dtype)),
        grid_spec=grid_spec,
        compiler_params=pltpu.CompilerParams(
            dimension_semantics=("arbitrary",)),     # time recurrence is sequential
    )(x, h0, wih, whh, bias)

    rnn_out = y.reshape(T, B, H)
    hidden_list = [h_last[l][None] for l in range(L)]   # each (1, B, H), like PyTorch
    return rnn_out, hidden_list


# ---------------------------------------------------------------------------
# Pure-JAX reference (for correctness check)
# ---------------------------------------------------------------------------
def _ref_layer(x, h0, w_ih, w_hh, b_ih, b_hh):
    def step(h, x_t):
        h_new = jnp.tanh(x_t @ w_ih.T + b_ih + h @ w_hh.T + b_hh)
        return h_new, h_new + x_t
    h_last, ys = jax.lax.scan(step, h0, x)
    return ys, h_last


def _ref_forward(emb, init_hidden_list, params):
    out = emb
    hiddens = []
    for layer_id, p in enumerate(params):
        out, h_last = _ref_layer(out, init_hidden_list[layer_id][0],
                                 p["w_ih"], p["w_hh"], p["b_ih"], p["b_hh"])
        hiddens.append(h_last[None])
    return out, hiddens


# ---------------------------------------------------------------------------
if __name__ == "__main__":
    # seq, batch, hidden (= ninp; residual requires it), layers, time-chunk
    T, B, H, L, TT = 16, 8, 128, 2, 8
    D = H

    key = jax.random.PRNGKey(0)
    k_emb, k_h0, k_p = jax.random.split(key, 3)

    emb = jax.random.normal(k_emb, (T, B, D), dtype=jnp.float32)
    hkeys = jax.random.split(k_h0, L)
    init_hidden_list = [jax.random.normal(hkeys[i], (1, B, H), dtype=jnp.float32)
                        for i in range(L)]

    # Deterministic param init, PyTorch-style uniform(-1/sqrt(H), 1/sqrt(H)).
    bound = 1.0 / (H ** 0.5)
    params = []
    pkeys = jax.random.split(k_p, L)
    for i in range(L):
        k1, k2, k3, k4 = jax.random.split(pkeys[i], 4)
        params.append({
            "w_ih": jax.random.uniform(k1, (H, D), jnp.float32, -bound, bound),
            "w_hh": jax.random.uniform(k2, (H, H), jnp.float32, -bound, bound),
            "b_ih": jax.random.uniform(k3, (H,), jnp.float32, -bound, bound),
            "b_hh": jax.random.uniform(k4, (H,), jnp.float32, -bound, bound),
        })

    rnn_out, hidden_list = res_rnn_forward(emb, init_hidden_list, params,
                                           time_chunk=TT)
    rnn_out = jax.block_until_ready(rnn_out)
    hidden_list = [jax.block_until_ready(h) for h in hidden_list]

    ref_out, ref_hiddens = _ref_forward(emb, init_hidden_list, params)
    assert rnn_out.shape == (T, B, H)
    assert jnp.allclose(rnn_out, ref_out, atol=1e-4, rtol=1e-4), \
        float(jnp.max(jnp.abs(rnn_out - ref_out)))
    for h, hr in zip(hidden_list, ref_hiddens):
        assert h.shape == (1, B, H)
        assert jnp.allclose(h, hr, atol=1e-4, rtol=1e-4), \
            float(jnp.max(jnp.abs(h - hr)))

    print("KERNEL_OK")
</pallas_src>

<mosaic_0001>
module attributes {stable_mosaic.version = 11 : i64} {
  func.func @_res_rnn_kernel(%arg0: i32, %arg1: memref<1x64x128xf32, #tpu.memory_space<vmem>>, %arg2: memref<2x8x128xf32, #tpu.memory_space<vmem>>, %arg3: memref<2x128x128xf32, #tpu.memory_space<vmem>>, %arg4: memref<2x128x128xf32, #tpu.memory_space<vmem>>, %arg5: memref<2x1x128xf32, #tpu.memory_space<vmem>>, %arg6: memref<1x64x128xf32, #tpu.memory_space<vmem>>, %arg7: memref<2x8x128xf32, #tpu.memory_space<vmem>>, %arg8: memref<2x8x128xf32, #tpu.memory_space<vmem>>, %arg9: memref<64x128xf32, #tpu.memory_space<vmem>>, %arg10: memref<64x128xf32, #tpu.memory_space<vmem>>) attributes {dimension_semantics = [#tpu.dimension_semantics<arbitrary>], iteration_bounds = array<i64: 2>, scalar_prefetch = 0 : i64, scratch_operands = 3 : i64, tpu.core_type = #tpu.core_type<tc>, window_params = [{transform_indices = @transform_0, window_bounds = array<i64: 1, 64, 128>}, {pipeline_mode = #tpu.pipeline_mode<synchronous>, transform_indices = @transform_1, window_bounds = array<i64: 2, 8, 128>}, {pipeline_mode = #tpu.pipeline_mode<synchronous>, transform_indices = @transform_2, window_bounds = array<i64: 2, 128, 128>}, {pipeline_mode = #tpu.pipeline_mode<synchronous>, transform_indices = @transform_3, window_bounds = array<i64: 2, 128, 128>}, {pipeline_mode = #tpu.pipeline_mode<synchronous>, transform_indices = @transform_4, window_bounds = array<i64: 2, 1, 128>}, {transform_indices = @transform_5, window_bounds = array<i64: 1, 64, 128>}, {pipeline_mode = #tpu.pipeline_mode<synchronous>, transform_indices = @transform_6, window_bounds = array<i64: 2, 8, 128>}]} {
    %c0_i32 = arith.constant 0 : i32
    %0 = arith.cmpi eq, %arg0, %c0_i32 : i32
    %1 = arith.extui %0 : i1 to i32
    %c0_i32_0 = arith.constant 0 : i32
    %2 = arith.cmpi ne, %1, %c0_i32_0 : i32
    scf.if %2 {
      %c0_140 = arith.constant 0 : index
      %c0_141 = arith.constant 0 : index
      %c0_142 = arith.constant 0 : index
      %237 = vector.load %arg2[%c0_140, %c0_141, %c0_142] : memref<2x8x128xf32, #tpu.memory_space<vmem>>, vector<2x8x128xf32>
      %c0_143 = arith.constant 0 : index
      %c0_144 = arith.constant 0 : index
      %c0_145 = arith.constant 0 : index
      %238 = vector.load %arg8[%c0_143, %c0_144, %c0_145] : memref<2x8x128xf32, #tpu.memory_space<vmem>>, vector<2x8x128xf32>
      tpu.vector_store %arg8[%c0_143, %c0_144, %c0_145], %237 {strides = array<i32>} : memref<2x8x128xf32, #tpu.memory_space<vmem>>, vector<2x8x128xf32>,
    } else {
    }
    %c0 = arith.constant 0 : index
    %c0_1 = arith.constant 0 : index
    %c0_2 = arith.constant 0 : index
    %3 = vector.load %arg1[%c0, %c0_1, %c0_2] : memref<1x64x128xf32, #tpu.memory_space<vmem>>, vector<1x64x128xf32>
    %4 = vector.shape_cast %3 : vector<1x64x128xf32> to vector<64x128xf32>
    %c0_3 = arith.constant 0 : index
    %c0_4 = arith.constant 0 : index
    %5 = vector.load %arg9[%c0_3, %c0_4] : memref<64x128xf32, #tpu.memory_space<vmem>>, vector<64x128xf32>
    tpu.vector_store %arg9[%c0_3, %c0_4], %4 {strides = array<i32>} : memref<64x128xf32, #tpu.memory_space<vmem>>, vector<64x128xf32>,
    %c0_5 = arith.constant 0 : index
    %c0_6 = arith.constant 0 : index
    %6 = vector.load %arg9[%c0_5, %c0_6] : memref<64x128xf32, #tpu.memory_space<vmem>>, vector<64x128xf32>
    %c0_7 = arith.constant 0 : index
    %c0_8 = arith.constant 0 : index
    %c0_9 = arith.constant 0 : index
    %7 = vector.load %arg3[%c0_7, %c0_8, %c0_9] : memref<2x128x128xf32, #tpu.memory_space<vmem>>, vector<1x128x128xf32>
    %8 = vector.shape_cast %7 : vector<1x128x128xf32> to vector<128x128xf32>
    %cst = arith.constant dense<0.000000e+00> : vector<64x128xf32>
    %9 = tpu.matmul %6, %8, %cst {dimension_numbers = #tpu.dot_dimension_numbers<[1], [0], [0], [1], [0, 0, 1, 1], [], []>} : vector<64x128xf32>, vector<128x128xf32>, vector<64x128xf32> -> vector<64x128xf32>
    %c0_10 = arith.constant 0 : index
    %c0_11 = arith.constant 0 : index
    %c0_12 = arith.constant 0 : index
    %10 = vector.load %arg5[%c0_10, %c0_11, %c0_12] : memref<2x1x128xf32, #tpu.memory_space<vmem>>, vector<1x1x128xf32>
    %11 = vector.shape_cast %10 : vector<1x1x128xf32> to vector<1x128xf32>
    %12 = vector.broadcast %11 : vector<1x128xf32> to vector<64x128xf32>
    %13 = arith.addf %9, %12 : vector<64x128xf32>
    %c0_13 = arith.constant 0 : index
    %c0_14 = arith.constant 0 : index
    %14 = vector.load %arg10[%c0_13, %c0_14] : memref<64x128xf32, #tpu.memory_space<vmem>>, vector<64x128xf32>
    tpu.vector_store %arg10[%c0_13, %c0_14], %13 {strides = array<i32>} : memref<64x128xf32, #tpu.memory_space<vmem>>, vector<64x128xf32>,
    %c0_15 = arith.constant 0 : index
    %c0_16 = arith.constant 0 : index
    %c0_17 = arith.constant 0 : index
    %15 = vector.load %arg4[%c0_15, %c0_16, %c0_17] : memref<2x128x128xf32, #tpu.memory_space<vmem>>, vector<1x128x128xf32>
    %16 = vector.shape_cast %15 : vector<1x128x128xf32> to vector<128x128xf32>
    %c0_18 = arith.constant 0 : index
    %c0_19 = arith.constant 0 : index
    %c0_20 = arith.constant 0 : index
    %17 = vector.load %arg8[%c0_18, %c0_19, %c0_20] : memref<2x8x128xf32, #tpu.memory_space<vmem>>, vector<1x8x128xf32>
    %18 = vector.shape_cast %17 : vector<1x8x128xf32> to vector<8x128xf32>
    %c0_i32_21 = arith.constant 0 : i32
    %c8_i32 = arith.constant 8 : i32
    %19 = arith.muli %c0_i32_21, %c8_i32 : i32
    %20 = tpu.assume_multiple %19, 8 : i32
    %21 = arith.index_cast %20 : i32 to index
    %c0_22 = arith.constant 0 : index
    %22 = vector.load %arg10[%21, %c0_22] : memref<64x128xf32, #tpu.memory_space<vmem>>, vector<8x128xf32>
    %cst_23 = arith.constant dense<0.000000e+00> : vector<8x128xf32>
    %23 = tpu.matmul %18, %16, %cst_23 {dimension_numbers = #tpu.dot_dimension_numbers<[1], [0], [0], [1], [0, 0, 1, 1], [], []>} : vector<8x128xf32>, vector<128x128xf32>, vector<8x128xf32> -> vector<8x128xf32>
    %24 = arith.addf %22, %23 : vector<8x128xf32>
    %25 = math.tanh %24 : vector<8x128xf32>
    %26 = arith.index_cast %20 : i32 to index
    %c0_24 = arith.constant 0 : index
    %27 = vector.load %arg9[%26, %c0_24] : memref<64x128xf32, #tpu.memory_space<vmem>>, vector<8x128xf32>
    %28 = arith.addf %27, %25 : vector<8x128xf32>
    %29 = arith.index_cast %20 : i32 to index
    %c0_25 = arith.constant 0 : index
    %30 = vector.load %arg9[%29, %c0_25] : memref<64x128xf32, #tpu.memory_space<vmem>>, vector<8x128xf32>
    tpu.vector_store %arg9[%29, %c0_25], %28 {strides = array<i32>} : memref<64x128xf32, #tpu.memory_space<vmem>>, vector<8x128xf32>,
    %c1_i32 = arith.constant 1 : i32
    %c8_i32_26 = arith.constant 8 : i32
    %31 = arith.muli %c1_i32, %c8_i32_26 : i32
    %32 = tpu.assume_multiple %31, 8 : i32
    %33 = arith.index_cast %32 : i32 to index
    %c0_27 = arith.constant 0 : index
    %34 = vector.load %arg10[%33, %c0_27] : memref<64x128xf32, #tpu.memory_space<vmem>>, vector<8x128xf32>
    %cst_28 = arith.constant dense<0.000000e+00> : vector<8x128xf32>
    %35 = tpu.matmul %25, %16, %cst_28 {dimension_numbers = #tpu.dot_dimension_numbers<[1], [0], [0], [1], [0, 0, 1, 1], [], []>} : vector<8x128xf32>, vector<128x128xf32>, vector<8x128xf32> -> vector<8x128xf32>
    %36 = arith.addf %34, %35 : vector<8x128xf32>
    %37 = math.tanh %36 : vector<8x128xf32>
    %38 = arith.index_cast %32 : i32 to index
    %c0_29 = arith.constant 0 : index
    %39 = vector.load %arg9[%38, %c0_29] : memref<64x128xf32, #tpu.memory_space<vmem>>, vector<8x128xf32>
    %40 = arith.addf %39, %37 : vector<8x128xf32>
    %41 = arith.index_cast %32 : i32 to index
    %c0_30 = arith.constant 0 : index
    %42 = vector.load %arg9[%41, %c0_30] : memref<64x128xf32, #tpu.memory_space<vmem>>, vector<8x128xf32>
    tpu.vector_store %arg9[%41, %c0_30], %40 {strides = array<i32>} : memref<64x128xf32, #tpu.memory_space<vmem>>, vector<8x128xf32>,
    %c2_i32 = arith.constant 2 : i32
    %c8_i32_31 = arith.constant 8 : i32
    %43 = arith.muli %c2_i32, %c8_i32_31 : i32
    %44 = tpu.assume_multiple %43, 8 : i32
    %45 = arith.index_cast %44 : i32 to index
    %c0_32 = arith.constant 0 : index
    %46 = vector.load %arg10[%45, %c0_32] : memref<64x128xf32, #tpu.memory_space<vmem>>, vector<8x128xf32>
    %cst_33 = arith.constant dense<0.000000e+00> : vector<8x128xf32>
    %47 = tpu.matmul %37, %16, %cst_33 {dimension_numbers = #tpu.dot_dimension_numbers<[1], [0], [0], [1], [0, 0, 1, 1], [], []>} : vector<8x128xf32>, vector<128x128xf32>, vector<8x128xf32> -> vector<8x128xf32>
    %48 = arith.addf %46, %47 : vector<8x128xf32>
    %49 = math.tanh %48 : vector<8x128xf32>
    %50 = arith.index_cast %44 : i32 to index
    %c0_34 = arith.constant 0 : index
    %51 = vector.load %arg9[%50, %c0_34] : memref<64x128xf32, #tpu.memory_space<vmem>>, vector<8x128xf32>
    %52 = arith.addf %51, %49 : vector<8x128xf32>
    %53 = arith.index_cast %44 : i32 to index
    %c0_35 = arith.constant 0 : index
    %54 = vector.load %arg9[%53, %c0_35] : memref<64x128xf32, #tpu.memory_space<vmem>>, vector<8x128xf32>
    tpu.vector_store %arg9[%53, %c0_35], %52 {strides = array<i32>} : memref<64x128xf32, #tpu.memory_space<vmem>>, vector<8x128xf32>,
    %c3_i32 = arith.constant 3 : i32
    %c8_i32_36 = arith.constant 8 : i32
    %55 = arith.muli %c3_i32, %c8_i32_36 : i32
    %56 = tpu.assume_multiple %55, 8 : i32
    %57 = arith.index_cast %56 : i32 to index
    %c0_37 = arith.constant 0 : index
    %58 = vector.load %arg10[%57, %c0_37] : memref<64x128xf32, #tpu.memory_space<vmem>>, vector<8x128xf32>
    %cst_38 = arith.constant dense<0.000000e+00> : vector<8x128xf32>
    %59 = tpu.matmul %49, %16, %cst_38 {dimension_numbers = #tpu.dot_dimension_numbers<[1], [0], [0], [1], [0, 0, 1, 1], [], []>} : vector<8x128xf32>, vector<128x128xf32>, vector<8x128xf32> -> vector<8x128xf32>
    %60 = arith.addf %58, %59 : vector<8x128xf32>
    %61 = math.tanh %60 : vector<8x128xf32>
    %62 = arith.index_cast %56 : i32 to index
    %c0_39 = arith.constant 0 : index
    %63 = vector.load %arg9[%62, %c0_39] : memref<64x128xf32, #tpu.memory_space<vmem>>, vector<8x128xf32>
    %64 = arith.addf %63, %61 : vector<8x128xf32>
    %65 = arith.index_cast %56 : i32 to index
    %c0_40 = arith.constant 0 : index
    %66 = vector.load %arg9[%65, %c0_40] : memref<64x128xf32, #tpu.memory_space<vmem>>, vector<8x128xf32>
    tpu.vector_store %arg9[%65, %c0_40], %64 {strides = array<i32>} : memref<64x128xf32, #tpu.memory_space<vmem>>, vector<8x128xf32>,
    %c4_i32 = arith.constant 4 : i32
    %c8_i32_41 = arith.constant 8 : i32
    %67 = arith.muli %c4_i32, %c8_i32_41 : i32
    %68 = tpu.assume_multiple %67, 8 : i32
    %69 = arith.index_cast %68 : i32 to index
    %c0_42 = arith.constant 0 : index
    %70 = vector.load %arg10[%69, %c0_42] : memref<64x128xf32, #tpu.memory_space<vmem>>, vector<8x128xf32>
    %cst_43 = arith.constant dense<0.000000e+00> : vector<8x128xf32>
    %71 = tpu.matmul %61, %16, %cst_43 {dimension_numbers = #tpu.dot_dimension_numbers<[1], [0], [0], [1], [0, 0, 1, 1], [], []>} : vector<8x128xf32>, vector<128x128xf32>, vector<8x128xf32> -> vector<8x128xf32>
    %72 = arith.addf %70, %71 : vector<8x128xf32>
    %73 = math.tanh %72 : vector<8x128xf32>
    %74 = arith.index_cast %68 : i32 to index
    %c0_44 = arith.constant 0 : index
    %75 = vector.load %arg9[%74, %c0_44] : memref<64x128xf32, #tpu.memory_space<vmem>>, vector<8x128xf32>
    %76 = arith.addf %75, %73 : vector<8x128xf32>
    %77 = arith.index_cast %68 : i32 to index
    %c0_45 = arith.constant 0 : index
    %78 = vector.load %arg9[%77, %c0_45] : memref<64x128xf32, #tpu.memory_space<vmem>>, vector<8x128xf32>
    tpu.vector_store %arg9[%77, %c0_45], %76 {strides = array<i32>} : memref<64x128xf32, #tpu.memory_space<vmem>>, vector<8x128xf32>,
    %c5_i32 = arith.constant 5 : i32
    %c8_i32_46 = arith.constant 8 : i32
    %79 = arith.muli %c5_i32, %c8_i32_46 : i32
    %80 = tpu.assume_multiple %79, 8 : i32
    %81 = arith.index_cast %80 : i32 to index
    %c0_47 = arith.constant 0 : index
    %82 = vector.load %arg10[%81, %c0_47] : memref<64x128xf32, #tpu.memory_space<vmem>>, vector<8x128xf32>
    %cst_48 = arith.constant dense<0.000000e+00> : vector<8x128xf32>
    %83 = tpu.matmul %73, %16, %cst_48 {dimension_numbers = #tpu.dot_dimension_numbers<[1], [0], [0], [1], [0, 0, 1, 1], [], []>} : vector<8x128xf32>, vector<128x128xf32>, vector<8x128xf32> -> vector<8x128xf32>
    %84 = arith.addf %82, %83 : vector<8x128xf32>
    %85 = math.tanh %84 : vector<8x128xf32>
    %86 = arith.index_cast %80 : i32 to index
    %c0_49 = arith.constant 0 : index
    %87 = vector.load %arg9[%86, %c0_49] : memref<64x128xf32, #tpu.memory_space<vmem>>, vector<8x128xf32>
    %88 = arith.addf %87, %85 : vector<8x128xf32>
    %89 = arith.index_cast %80 : i32 to index
    %c0_50 = arith.constant 0 : index
    %90 = vector.load %arg9[%89, %c0_50] : memref<64x128xf32, #tpu.memory_space<vmem>>, vector<8x128xf32>
    tpu.vector_store %arg9[%89, %c0_50], %88 {strides = array<i32>} : memref<64x128xf32, #tpu.memory_space<vmem>>, vector<8x128xf32>,
    %c6_i32 = arith.constant 6 : i32
    %c8_i32_51 = arith.constant 8 : i32
    %91 = arith.muli %c6_i32, %c8_i32_51 : i32
    %92 = tpu.assume_multiple %91, 8 : i32
    %93 = arith.index_cast %92 : i32 to index
    %c0_52 = arith.constant 0 : index
    %94 = vector.load %arg10[%93, %c0_52] : memref<64x128xf32, #tpu.memory_space<vmem>>, vector<8x128xf32>
    %cst_53 = arith.constant dense<0.000000e+00> : vector<8x128xf32>
    %95 = tpu.matmul %85, %16, %cst_53 {dimension_numbers = #tpu.dot_dimension_numbers<[1], [0], [0], [1], [0, 0, 1, 1], [], []>} : vector<8x128xf32>, vector<128x128xf32>, vector<8x128xf32> -> vector<8x128xf32>
    %96 = arith.addf %94, %95 : vector<8x128xf32>
    %97 = math.tanh %96 : vector<8x128xf32>
    %98 = arith.index_cast %92 : i32 to index
    %c0_54 = arith.constant 0 : index
    %99 = vector.load %arg9[%98, %c0_54] : memref<64x128xf32, #tpu.memory_space<vmem>>, vector<8x128xf32>
    %100 = arith.addf %99, %97 : vector<8x128xf32>
    %101 = arith.index_cast %92 : i32 to index
    %c0_55 = arith.constant 0 : index
    %102 = vector.load %arg9[%101, %c0_55] : memref<64x128xf32, #tpu.memory_space<vmem>>, vector<8x128xf32>
    tpu.vector_store %arg9[%101, %c0_55], %100 {strides = array<i32>} : memref<64x128xf32, #tpu.memory_space<vmem>>, vector<8x128xf32>,
    %c7_i32 = arith.constant 7 : i32
    %c8_i32_56 = arith.constant 8 : i32
    %103 = arith.muli %c7_i32, %c8_i32_56 : i32
    %104 = tpu.assume_multiple %103, 8 : i32
    %105 = arith.index_cast %104 : i32 to index
    %c0_57 = arith.constant 0 : index
    %106 = vector.load %arg10[%105, %c0_57] : memref<64x128xf32, #tpu.memory_space<vmem>>, vector<8x128xf32>
    %cst_58 = arith.constant dense<0.000000e+00> : vector<8x128xf32>
    %107 = tpu.matmul %97, %16, %cst_58 {dimension_numbers = #tpu.dot_dimension_numbers<[1], [0], [0], [1], [0, 0, 1, 1], [], []>} : vector<8x128xf32>, vector<128x128xf32>, vector<8x128xf32> -> vector<8x128xf32>
    %108 = arith.addf %106, %107 : vector<8x128xf32>
    %109 = math.tanh %108 : vector<8x128xf32>
    %110 = arith.index_cast %104 : i32 to index
    %c0_59 = arith.constant 0 : index
    %111 = vector.load %arg9[%110, %c0_59] : memref<64x128xf32, #tpu.memory_space<vmem>>, vector<8x128xf32>
    %112 = arith.addf %111, %109 : vector<8x128xf32>
    %113 = arith.index_cast %104 : i32 to index
    %c0_60 = arith.constant 0 : index
    %114 = vector.load %arg9[%113, %c0_60] : memref<64x128xf32, #tpu.memory_space<vmem>>, vector<8x128xf32>
    tpu.vector_store %arg9[%113, %c0_60], %112 {strides = array<i32>} : memref<64x128xf32, #tpu.memory_space<vmem>>, vector<8x128xf32>,
    %c8_i32_61 = arith.constant 8 : i32
    %c0_62 = arith.constant 0 : index
    %c0_63 = arith.constant 0 : index
    %c0_64 = arith.constant 0 : index
    %115 = vector.load %arg8[%c0_62, %c0_63, %c0_64] : memref<2x8x128xf32, #tpu.memory_space<vmem>>, vector<1x8x128xf32>
    %116 = vector.shape_cast %115 : vector<1x8x128xf32> to vector<8x128xf32>
    %117 = vector.shape_cast %109 : vector<8x128xf32> to vector<1x8x128xf32>
    tpu.vector_store %arg8[%c0_62, %c0_63, %c0_64], %117 {strides = array<i32>} : memref<2x8x128xf32, #tpu.memory_space<vmem>>, vector<1x8x128xf32>,
    %c0_65 = arith.constant 0 : index
    %c0_66 = arith.constant 0 : index
    %118 = vector.load %arg9[%c0_65, %c0_66] : memref<64x128xf32, #tpu.memory_space<vmem>>, vector<64x128xf32>
    %c1 = arith.constant 1 : index
    %c0_67 = arith.constant 0 : index
    %c0_68 = arith.constant 0 : index
    %119 = vector.load %arg3[%c1, %c0_67, %c0_68] : memref<2x128x128xf32, #tpu.memory_space<vmem>>, vector<1x128x128xf32>
    %120 = vector.shape_cast %119 : vector<1x128x128xf32> to vector<128x128xf32>
    %cst_69 = arith.constant dense<0.000000e+00> : vector<64x128xf32>
    %121 = tpu.matmul %118, %120, %cst_69 {dimension_numbers = #tpu.dot_dimension_numbers<[1], [0], [0], [1], [0, 0, 1, 1], [], []>} : vector<64x128xf32>, vector<128x128xf32>, vector<64x128xf32> -> vector<64x128xf32>
    %c1_70 = arith.constant 1 : index
    %c0_71 = arith.constant 0 : index
    %c0_72 = arith.constant 0 : index
    %122 = vector.load %arg5[%c1_70, %c0_71, %c0_72] : memref<2x1x128xf32, #tpu.memory_space<vmem>>, vector<1x1x128xf32>
    %123 = vector.shape_cast %122 : vector<1x1x128xf32> to vector<1x128xf32>
    %124 = vector.broadcast %123 : vector<1x128xf32> to vector<64x128xf32>
    %125 = arith.addf %121, %124 : vector<64x128xf32>
    %c0_73 = arith.constant 0 : index
    %c0_74 = arith.constant 0 : index
    %126 = vector.load %arg10[%c0_73, %c0_74] : memref<64x128xf32, #tpu.memory_space<vmem>>, vector<64x128xf32>
    tpu.vector_store %arg10[%c0_73, %c0_74], %125 {strides = array<i32>} : memref<64x128xf32, #tpu.memory_space<vmem>>, vector<64x128xf32>,
    %c1_75 = arith.constant 1 : index
    %c0_76 = arith.constant 0 : index
    %c0_77 = arith.constant 0 : index
    %127 = vector.load %arg4[%c1_75, %c0_76, %c0_77] : memref<2x128x128xf32, #tpu.memory_space<vmem>>, vector<1x128x128xf32>
    %128 = vector.shape_cast %127 : vector<1x128x128xf32> to vector<128x128xf32>
    %c1_78 = arith.constant 1 : index
    %c0_79 = arith.constant 0 : index
    %c0_80 = arith.constant 0 : index
    %129 = vector.load %arg8[%c1_78, %c0_79, %c0_80] : memref<2x8x128xf32, #tpu.memory_space<vmem>>, vector<1x8x128xf32>
    %130 = vector.shape_cast %129 : vector<1x8x128xf32> to vector<8x128xf32>
    %c0_i32_81 = arith.constant 0 : i32
    %c8_i32_82 = arith.constant 8 : i32
    %131 = arith.muli %c0_i32_81, %c8_i32_82 : i32
    %132 = tpu.assume_multiple %131, 8 : i32
    %133 = arith.index_cast %132 : i32 to index
    %c0_83 = arith.constant 0 : index
    %134 = vector.load %arg10[%133, %c0_83] : memref<64x128xf32, #tpu.memory_space<vmem>>, vector<8x128xf32>
    %cst_84 = arith.constant dense<0.000000e+00> : vector<8x128xf32>
    %135 = tpu.matmul %130, %128, %cst_84 {dimension_numbers = #tpu.dot_dimension_numbers<[1], [0], [0], [1], [0, 0, 1, 1], [], []>} : vector<8x128xf32>, vector<128x128xf32>, vector<8x128xf32> -> vector<8x128xf32>
    %136 = arith.addf %134, %135 : vector<8x128xf32>
    %137 = math.tanh %136 : vector<8x128xf32>
    %138 = arith.index_cast %132 : i32 to index
    %c0_85 = arith.constant 0 : index
    %139 = vector.load %arg9[%138, %c0_85] : memref<64x128xf32, #tpu.memory_space<vmem>>, vector<8x128xf32>
    %140 = arith.addf %139, %137 : vector<8x128xf32>
    %141 = arith.index_cast %132 : i32 to index
    %c0_86 = arith.constant 0 : index
    %142 = vector.load %arg9[%141, %c0_86] : memref<64x128xf32, #tpu.memory_space<vmem>>, vector<8x128xf32>
    tpu.vector_store %arg9[%141, %c0_86], %140 {strides = array<i32>} : memref<64x128xf32, #tpu.memory_space<vmem>>, vector<8x128xf32>,
    %c1_i32_87 = arith.constant 1 : i32
    %c8_i32_88 = arith.constant 8 : i32
    %143 = arith.muli %c1_i32_87, %c8_i32_88 : i32
    %144 = tpu.assume_multiple %143, 8 : i32
    %145 = arith.index_cast %144 : i32 to index
    %c0_89 = arith.constant 0 : index
    %146 = vector.load %arg10[%145, %c0_89] : memref<64x128xf32, #tpu.memory_space<vmem>>, vector<8x128xf32>
    %cst_90 = arith.constant dense<0.000000e+00> : vector<8x128xf32>
    %147 = tpu.matmul %137, %128, %cst_90 {dimension_numbers = #tpu.dot_dimension_numbers<[1], [0], [0], [1], [0, 0, 1, 1], [], []>} : vector<8x128xf32>, vector<128x128xf32>, vector<8x128xf32> -> vector<8x128xf32>
    %148 = arith.addf %146, %147 : vector<8x128xf32>
    %149 = math.tanh %148 : vector<8x128xf32>
    %150 = arith.index_cast %144 : i32 to index
    %c0_91 = arith.constant 0 : index
    %151 = vector.load %arg9[%150, %c0_91] : memref<64x128xf32, #tpu.memory_space<vmem>>, vector<8x128xf32>
    %152 = arith.addf %151, %149 : vector<8x128xf32>
    %153 = arith.index_cast %144 : i32 to index
    %c0_92 = arith.constant 0 : index
    %154 = vector.load %arg9[%153, %c0_92] : memref<64x128xf32, #tpu.memory_space<vmem>>, vector<8x128xf32>
    tpu.vector_store %arg9[%153, %c0_92], %152 {strides = array<i32>} : memref<64x128xf32, #tpu.memory_space<vmem>>, vector<8x128xf32>,
    %c2_i32_93 = arith.constant 2 : i32
    %c8_i32_94 = arith.constant 8 : i32
    %155 = arith.muli %c2_i32_93, %c8_i32_94 : i32
    %156 = tpu.assume_multiple %155, 8 : i32
    %157 = arith.index_cast %156 : i32 to index
    %c0_95 = arith.constant 0 : index
    %158 = vector.load %arg10[%157, %c0_95] : memref<64x128xf32, #tpu.memory_space<vmem>>, vector<8x128xf32>
    %cst_96 = arith.constant dense<0.000000e+00> : vector<8x128xf32>
    %159 = tpu.matmul %149, %128, %cst_96 {dimension_numbers = #tpu.dot_dimension_numbers<[1], [0], [0], [1], [0, 0, 1, 1], [], []>} : vector<8x128xf32>, vector<128x128xf32>, vector<8x128xf32> -> vector<8x128xf32>
    %160 = arith.addf %158, %159 : vector<8x128xf32>
    %161 = math.tanh %160 : vector<8x128xf32>
    %162 = arith.index_cast %156 : i32 to index
    %c0_97 = arith.constant 0 : index
    %163 = vector.load %arg9[%162, %c0_97] : memref<64x128xf32, #tpu.memory_space<vmem>>, vector<8x128xf32>
    %164 = arith.addf %163, %161 : vector<8x128xf32>
    %165 = arith.index_cast %156 : i32 to index
    %c0_98 = arith.constant 0 : index
    %166 = vector.load %arg9[%165, %c0_98] : memref<64x128xf32, #tpu.memory_space<vmem>>, vector<8x128xf32>
    tpu.vector_store %arg9[%165, %c0_98], %164 {strides = array<i32>} : memref<64x128xf32, #tpu.memory_space<vmem>>, vector<8x128xf32>,
    %c3_i32_99 = arith.constant 3 : i32
    %c8_i32_100 = arith.constant 8 : i32
    %167 = arith.muli %c3_i32_99, %c8_i32_100 : i32
    %168 = tpu.assume_multiple %167, 8 : i32
    %169 = arith.index_cast %168 : i32 to index
    %c0_101 = arith.constant 0 : index
    %170 = vector.load %arg10[%169, %c0_101] : memref<64x128xf32, #tpu.memory_space<vmem>>, vector<8x128xf32>
    %cst_102 = arith.constant dense<0.000000e+00> : vector<8x128xf32>
    %171 = tpu.matmul %161, %128, %cst_102 {dimension_numbers = #tpu.dot_dimension_numbers<[1], [0], [0], [1], [0, 0, 1, 1], [], []>} : vector<8x128xf32>, vector<128x128xf32>, vector<8x128xf32> -> vector<8x128xf32>
    %172 = arith.addf %170, %171 : vector<8x128xf32>
    %173 = math.tanh %172 : vector<8x128xf32>
    %174 = arith.index_cast %168 : i32 to index
    %c0_103 = arith.constant 0 : index
    %175 = vector.load %arg9[%174, %c0_103] : memref<64x128xf32, #tpu.memory_space<vmem>>, vector<8x128xf32>
    %176 = arith.addf %175, %173 : vector<8x128xf32>
    %177 = arith.index_cast %168 : i32 to index
    %c0_104 = arith.constant 0 : index
    %178 = vector.load %arg9[%177, %c0_104] : memref<64x128xf32, #tpu.memory_space<vmem>>, vector<8x128xf32>
    tpu.vector_store %arg9[%177, %c0_104], %176 {strides = array<i32>} : memref<64x128xf32, #tpu.memory_space<vmem>>, vector<8x128xf32>,
    %c4_i32_105 = arith.constant 4 : i32
    %c8_i32_106 = arith.constant 8 : i32
    %179 = arith.muli %c4_i32_105, %c8_i32_106 : i32
    %180 = tpu.assume_multiple %179, 8 : i32
    %181 = arith.index_cast %180 : i32 to index
    %c0_107 = arith.constant 0 : index
    %182 = vector.load %arg10[%181, %c0_107] : memref<64x128xf32, #tpu.memory_space<vmem>>, vector<8x128xf32>
    %cst_108 = arith.constant dense<0.000000e+00> : vector<8x128xf32>
    %183 = tpu.matmul %173, %128, %cst_108 {dimension_numbers = #tpu.dot_dimension_numbers<[1], [0], [0], [1], [0, 0, 1, 1], [], []>} : vector<8x128xf32>, vector<128x128xf32>, vector<8x128xf32> -> vector<8x128xf32>
    %184 = arith.addf %182, %183 : vector<8x128xf32>
    %185 = math.tanh %184 : vector<8x128xf32>
    %186 = arith.index_cast %180 : i32 to index
    %c0_109 = arith.constant 0 : index
    %187 = vector.load %arg9[%186, %c0_109] : memref<64x128xf32, #tpu.memory_space<vmem>>, vector<8x128xf32>
    %188 = arith.addf %187, %185 : vector<8x128xf32>
    %189 = arith.index_cast %180 : i32 to index
    %c0_110 = arith.constant 0 : index
    %190 = vector.load %arg9[%189, %c0_110] : memref<64x128xf32, #tpu.memory_space<vmem>>, vector<8x128xf32>
    tpu.vector_store %arg9[%189, %c0_110], %188 {strides = array<i32>} : memref<64x128xf32, #tpu.memory_space<vmem>>, vector<8x128xf32>,
    %c5_i32_111 = arith.constant 5 : i32
    %c8_i32_112 = arith.constant 8 : i32
    %191 = arith.muli %c5_i32_111, %c8_i32_112 : i32
    %192 = tpu.assume_multiple %191, 8 : i32
    %193 = arith.index_cast %192 : i32 to index
    %c0_113 = arith.constant 0 : index
    %194 = vector.load %arg10[%193, %c0_113] : memref<64x128xf32, #tpu.memory_space<vmem>>, vector<8x128xf32>
    %cst_114 = arith.constant dense<0.000000e+00> : vector<8x128xf32>
    %195 = tpu.matmul %185, %128, %cst_114 {dimension_numbers = #tpu.dot_dimension_numbers<[1], [0], [0], [1], [0, 0, 1, 1], [], []>} : vector<8x128xf32>, vector<128x128xf32>, vector<8x128xf32> -> vector<8x128xf32>
    %196 = arith.addf %194, %195 : vector<8x128xf32>
    %197 = math.tanh %196 : vector<8x128xf32>
    %198 = arith.index_cast %192 : i32 to index
    %c0_115 = arith.constant 0 : index
    %199 = vector.load %arg9[%198, %c0_115] : memref<64x128xf32, #tpu.memory_space<vmem>>, vector<8x128xf32>
    %200 = arith.addf %199, %197 : vector<8x128xf32>
    %201 = arith.index_cast %192 : i32 to index
    %c0_116 = arith.constant 0 : index
    %202 = vector.load %arg9[%201, %c0_116] : memref<64x128xf32, #tpu.memory_space<vmem>>, vector<8x128xf32>
    tpu.vector_store %arg9[%201, %c0_116], %200 {strides = array<i32>} : memref<64x128xf32, #tpu.memory_space<vmem>>, vector<8x128xf32>,
    %c6_i32_117 = arith.constant 6 : i32
    %c8_i32_118 = arith.constant 8 : i32
    %203 = arith.muli %c6_i32_117, %c8_i32_118 : i32
    %204 = tpu.assume_multiple %203, 8 : i32
    %205 = arith.index_cast %204 : i32 to index
    %c0_119 = arith.constant 0 : index
    %206 = vector.load %arg10[%205, %c0_119] : memref<64x128xf32, #tpu.memory_space<vmem>>, vector<8x128xf32>
    %cst_120 = arith.constant dense<0.000000e+00> : vector<8x128xf32>
    %207 = tpu.matmul %197, %128, %cst_120 {dimension_numbers = #tpu.dot_dimension_numbers<[1], [0], [0], [1], [0, 0, 1, 1], [], []>} : vector<8x128xf32>, vector<128x128xf32>, vector<8x128xf32> -> vector<8x128xf32>
    %208 = arith.addf %206, %207 : vector<8x128xf32>
    %209 = math.tanh %208 : vector<8x128xf32>
    %210 = arith.index_cast %204 : i32 to index
    %c0_121 = arith.constant 0 : index
    %211 = vector.load %arg9[%210, %c0_121] : memref<64x128xf32, #tpu.memory_space<vmem>>, vector<8x128xf32>
    %212 = arith.addf %211, %209 : vector<8x128xf32>
    %213 = arith.index_cast %204 : i32 to index
    %c0_122 = arith.constant 0 : index
    %214 = vector.load %arg9[%213, %c0_122] : memref<64x128xf32, #tpu.memory_space<vmem>>, vector<8x128xf32>
    tpu.vector_store %arg9[%213, %c0_122], %212 {strides = array<i32>} : memref<64x128xf32, #tpu.memory_space<vmem>>, vector<8x128xf32>,
    %c7_i32_123 = arith.constant 7 : i32
    %c8_i32_124 = arith.constant 8 : i32
    %215 = arith.muli %c7_i32_123, %c8_i32_124 : i32
    %216 = tpu.assume_multiple %215, 8 : i32
    %217 = arith.index_cast %216 : i32 to index
    %c0_125 = arith.constant 0 : index
    %218 = vector.load %arg10[%217, %c0_125] : memref<64x128xf32, #tpu.memory_space<vmem>>, vector<8x128xf32>
    %cst_126 = arith.constant dense<0.000000e+00> : vector<8x128xf32>
    %219 = tpu.matmul %209, %128, %cst_126 {dimension_numbers = #tpu.dot_dimension_numbers<[1], [0], [0], [1], [0, 0, 1, 1], [], []>} : vector<8x128xf32>, vector<128x128xf32>, vector<8x128xf32> -> vector<8x128xf32>
    %220 = arith.addf %218, %219 : vector<8x128xf32>
    %221 = math.tanh %220 : vector<8x128xf32>
    %222 = arith.index_cast %216 : i32 to index
    %c0_127 = arith.constant 0 : index
    %223 = vector.load %arg9[%222, %c0_127] : memref<64x128xf32, #tpu.memory_space<vmem>>, vector<8x128xf32>
    %224 = arith.addf %223, %221 : vector<8x128xf32>
    %225 = arith.index_cast %216 : i32 to index
    %c0_128 = arith.constant 0 : index
    %226 = vector.load %arg9[%225, %c0_128] : memref<64x128xf32, #tpu.memory_space<vmem>>, vector<8x128xf32>
    tpu.vector_store %arg9[%225, %c0_128], %224 {strides = array<i32>} : memref<64x128xf32, #tpu.memory_space<vmem>>, vector<8x128xf32>,
    %c8_i32_129 = arith.constant 8 : i32
    %c1_130 = arith.constant 1 : index
    %c0_131 = arith.constant 0 : index
    %c0_132 = arith.constant 0 : index
    %227 = vector.load %arg8[%c1_130, %c0_131, %c0_132] : memref<2x8x128xf32, #tpu.memory_space<vmem>>, vector<1x8x128xf32>
    %228 = vector.shape_cast %227 : vector<1x8x128xf32> to vector<8x128xf32>
    %229 = vector.shape_cast %221 : vector<8x128xf32> to vector<1x8x128xf32>
    tpu.vector_store %arg8[%c1_130, %c0_131, %c0_132], %229 {strides = array<i32>} : memref<2x8x128xf32, #tpu.memory_space<vmem>>, vector<1x8x128xf32>,
    %c0_133 = arith.constant 0 : index
    %c0_134 = arith.constant 0 : index
    %230 = vector.load %arg9[%c0_133, %c0_134] : memref<64x128xf32, #tpu.memory_space<vmem>>, vector<64x128xf32>
    %c0_135 = arith.constant 0 : index
    %c0_136 = arith.constant 0 : index
    %c0_137 = arith.constant 0 : index
    %231 = vector.load %arg6[%c0_135, %c0_136, %c0_137] : memref<1x64x128xf32, #tpu.memory_space<vmem>>, vector<1x64x128xf32>
    %232 = vector.shape_cast %231 : vector<1x64x128xf32> to vector<64x128xf32>
    %233 = vector.shape_cast %230 : vector<64x128xf32> to vector<1x64x128xf32>
    tpu.vector_store %arg6[%c0_135, %c0_136, %c0_137], %233 {strides = array<i32>} : memref<1x64x128xf32, #tpu.memory_space<vmem>>, vector<1x64x128xf32>,
    %c1_i32_138 = arith.constant 1 : i32
    %234 = arith.cmpi eq, %arg0, %c1_i32_138 : i32
    %235 = arith.extui %234 : i1 to i32
    %c0_i32_139 = arith.constant 0 : i32
    %236 = arith.cmpi ne, %235, %c0_i32_139 : i32
    scf.if %236 {
      %c0_140 = arith.constant 0 : index
      %c0_141 = arith.constant 0 : index
      %c0_142 = arith.constant 0 : index
      %237 = vector.load %arg8[%c0_140, %c0_141, %c0_142] : memref<2x8x128xf32, #tpu.memory_space<vmem>>, vector<2x8x128xf32>
      %c0_143 = arith.constant 0 : index
      %c0_144 = arith.constant 0 : index
      %c0_145 = arith.constant 0 : index
      %238 = vector.load %arg7[%c0_143, %c0_144, %c0_145] : memref<2x8x128xf32, #tpu.memory_space<vmem>>, vector<2x8x128xf32>
      tpu.vector_store %arg7[%c0_143, %c0_144, %c0_145], %237 {strides = array<i32>} : memref<2x8x128xf32, #tpu.memory_space<vmem>>, vector<2x8x128xf32>,
    } else {
    }
    return
  }
  func.func @transform_0(%arg0: i32) -> (i32, i32, i32) {
    %c0_i32 = arith.constant 0 : i32
    %c0_i32_0 = arith.constant 0 : i32
    %c0_i32_1 = arith.constant 0 : i32
    return %arg0, %c0_i32, %c0_i32_0 : i32, i32, i32
  }
  func.func @transform_1(%arg0: i32) -> (i32, i32, i32) {
    %c0_i32 = arith.constant 0 : i32
    %c0_i32_0 = arith.constant 0 : i32
    %c0_i32_1 = arith.constant 0 : i32
    %c0_i32_2 = arith.constant 0 : i32
    return %c0_i32, %c0_i32_0, %c0_i32_1 : i32, i32, i32
  }
  func.func @transform_2(%arg0: i32) -> (i32, i32, i32) {
    %c0_i32 = arith.constant 0 : i32
    %c0_i32_0 = arith.constant 0 : i32
    %c0_i32_1 = arith.constant 0 : i32
    %c0_i32_2 = arith.constant 0 : i32
    return %c0_i32, %c0_i32_0, %c0_i32_1 : i32, i32, i32
  }
  func.func @transform_3(%arg0: i32) -> (i32, i32, i32) {
    %c0_i32 = arith.constant 0 : i32
    %c0_i32_0 = arith.constant 0 : i32
    %c0_i32_1 = arith.constant 0 : i32
    %c0_i32_2 = arith.constant 0 : i32
    return %c0_i32, %c0_i32_0, %c0_i32_1 : i32, i32, i32
  }
  func.func @transform_4(%arg0: i32) -> (i32, i32, i32) {
    %c0_i32 = arith.constant 0 : i32
    %c0_i32_0 = arith.constant 0 : i32
    %c0_i32_1 = arith.constant 0 : i32
    %c0_i32_2 = arith.constant 0 : i32
    return %c0_i32, %c0_i32_0, %c0_i32_1 : i32, i32, i32
  }
  func.func @transform_5(%arg0: i32) -> (i32, i32, i32) {
    %c0_i32 = arith.constant 0 : i32
    %c0_i32_0 = arith.constant 0 : i32
    %c0_i32_1 = arith.constant 0 : i32
    return %arg0, %c0_i32, %c0_i32_0 : i32, i32, i32
  }
  func.func @transform_6(%arg0: i32) -> (i32, i32, i32) {
    %c0_i32 = arith.constant 0 : i32
    %c0_i32_0 = arith.constant 0 : i32
    %c0_i32_1 = arith.constant 0 : i32
    %c0_i32_2 = arith.constant 0 : i32
    return %c0_i32, %c0_i32_0, %c0_i32_1 : i32, i32, i32
  }
}

</mosaic_0001>

<bundles_post_ra>
// kernel: tpu_custom_call.1
= control target key start
LH: loop header
LB: loop body
LE: loop exit
PB: predicated region body
PF: predicated region fallthrough
CT: control target
= control target key end

     0   :  { %12 = vsyncpa [#allocation6], 0  ;;  %s4676_s0 = inlined_call_operand.hbm [shape: f32[2,64,128], index: 0, kind: input, shape index: {}]   ;;  %s4677_s1 = inlined_call_operand.hbm [shape: f32[2,8,128], index: 1, kind: input, shape index: {}]   ;;  %s4678_s2 = inlined_call_operand.hbm [shape: f32[2,128,128], index: 2, kind: input, shape index: {}]   ;;  %s4679_s3 = inlined_call_operand.hbm [shape: f32[2,128,128], index: 3, kind: input, shape index: {}]   ;;  %s4680_s4 = inlined_call_operand.vmem [shape: f32[2,1,128], index: 4, kind: input, shape index: {}]   ;;  %s4681_s5 = inlined_call_operand.hbm [shape: f32[2,64,128], index: 5, kind: output, shape index: {0}]   ;;  %s4682_s6 = inlined_call_operand.hbm [shape: f32[2,8,128], index: 6, kind: output, shape index: {1}]  }
   0x1   :  { %14 = vsyncpa [#allocation6 + $0x1], 0 }
   0x2   :  { %15 = vsyncpa [#allocation9], 0 }
   0x3   :  { %16 = vsyncpa [#allocation12], 0 }
   0x4   :  { %17 = vsyncpa [#allocation7], 0 }
   0x5   :  { %19 = vsyncpa [#allocation7 + $0x1], 0 }
   0x6   :  { %20 = vsyncpa [#allocation15], 0  ;;  %s3895_s21 = smov 0   ;;  %s3897_s22 = smov 0  }
   0x7   :  { %s3899_s23 = smov 0   ;;  %s3901_s24 = smov 0  }
   0x8 LB: > { %s3916_s25 = sadd.s32 4294967295, %s3845_s24   ;;  %s2059_s26 = sadd.s32 4294967294, %s3845_s24   ;;  %s3845_s24 = sphi %s3901_s24, %s4711_s24   ;;  %s3841_s23 = sphi %s3899_s23, %s4710_s23   ;;  %s3837_s22 = sphi %s3897_s22, %s4709_s22   ;;  %s3833_s21 = sphi %s3895_s21, %s4708_s21  }
   0x9   : > { %p46_p0 = scmp.ne.s32.totalorder %s3837_s22, %s3833_s21  ;;  %p4683_p1 = scmp.eq.s32.totalorder %s3916_s25, 0 }
   0xa   : > { %p160_p3 = scmp.eq.s32.totalorder %s2059_s26, 1  ;;  %p2060_p5 = scmp.ge.s32.totalorder %s3845_s24, 1 }
   0xb   : > { %p3925_p4 = por %p4683_p1, %p46_p0  ;;  %p188_p7 = scmp.lt.s32.totalorder %s3845_s24, 3 }
   0xc   : > { %p3930_p6 = por %p160_p3, %p46_p0  ;;  %s3847_s30 = smov [#allocation8]  }
   0xd   : > { %s4686_s27 = scalar_select %p3925_p4, 1, 0 }
   0xe   : > { %s4687_s28 = scalar_select %p3930_p6, 1, 0 }
   0xf   : > { %p3936_p9 = pnand %p2060_p5, %p188_p7  ;;  %s200_s7 = sshll.u32 %s3847_s30, 4  ;;  %s3940_s7 = int_to_ptr.vmem [resolvable:$true] %s200_s7 }
  0x10   : > { %s3848_s9 = smov [#allocation10]   ;;  %s3849_s11 = smov [#allocation11]  }
  0x11   : > { %s4688_s29 = scalar_select %p3936_p9, 1, 0 }
  0x12   : > { %p3524_p10 = pneg %p3936_p9  ;;  %s213_s10 = sshll.u32 %s3848_s9, 4  ;;  %s3951_s10 = int_to_ptr.vmem [resolvable:$true] %s213_s10 }
  0x13   : > { %s3953_s12 = sshll.u32 %s3849_s11, 4  ;;  %s3627_s15 = scalar_lea.hbm %s4677_s1, 256  ;;  %s227_s12 = int_to_ptr.vmem [resolvable:$true] %s3953_s12 }
  0x14   : > { %p3947_p12 = pnand %p3524_p10, %p4683_p1  ;;  %p3628_p13 = scmp.ne.s32.totalorder %s4677_s1, %s3627_s15 }
  0x15   : > { %p3634_p7 = scmp.lt.u32.totalorder %s3627_s15, %s4677_s1 }
  0x16   : > { %p3963_p0 = pneg %p3947_p12 }
  0x18   : > { %p3630_p3 = pnand %p3963_p0, %p3628_p13 }
  0x1a   : > { %p3631_p5 = pneg %p3630_p3 }
  0x1c   : > { %p3636_p10 = pnand %p3634_p7, %p3631_p5 }
  0x1e   : > { %3639 = shalt.err (!%p3636_p10)
}
  0x1f   : > { %s3640_s26 = scalar_lea.vmem %s3940_s7, 256  ;;  %p3648_p2 = scmp.lt.s32.totalorder %s3940_s7, %s3940_s7 }
  0x20   : > { %p3641_p11 = scmp.ne.s32.totalorder %s3940_s7, %s3640_s26  ;;  %p3649_p6 = scmp.lt.s32.totalorder %s3640_s26, %s3640_s26 }
  0x22   : > { %p3643_p8 = pnand %p3641_p11, %p3963_p0  ;;  %p3650_p13 = por %p3649_p6, %p3648_p2 }
  0x24   : > { %p3644_p1 = pneg %p3643_p8 }
  0x26   : > { %p3651_p3 = pnand %p3650_p13, %p3644_p1 }
  0x28   : > { %3654 = shalt.err (!%p3651_p3)
}
  0x29   : > { %s3850_s30 = smov 128   ;;  %s3851_s9 = smov 8  }
  0x2a   : > { %3527 = dma.hbm_to_vmem [thread:$0]  (!%p3947_p12), %s4677_s1, 256, %s3940_s7, [#allocation9], %s3850_s30, %s3850_s30, %s3851_s9  }
  0x2b   : > { %s3655_s16 = scalar_lea.hbm %s4678_s2, 4096 }
  0x2c   : > { %p3656_p1 = scmp.ne.s32.totalorder %s4678_s2, %s3655_s16  ;;  %p3662_p8 = scmp.lt.u32.totalorder %s3655_s16, %s4678_s2 }
  0x2e   : > { %p3658_p2 = pnand %p3656_p1, %p3963_p0 }
  0x30   : > { %p3659_p6 = pneg %p3658_p2 }
  0x32   : > { %p3664_p11 = pnand %p3662_p8, %p3659_p6 }
  0x34   : > { %3667 = shalt.err (!%p3664_p11)
}
  0x35   : > { %s3668_s7 = scalar_lea.vmem %s3951_s10, 4096  ;;  %p3676_p13 = scmp.lt.s32.totalorder %s3951_s10, %s3951_s10 }
  0x36   : > { %p3669_p5 = scmp.ne.s32.totalorder %s3951_s10, %s3668_s7  ;;  %p3677_p3 = scmp.lt.s32.totalorder %s3668_s7, %s3668_s7 }
  0x38   : > { %p3671_p7 = pnand %p3669_p5, %p3963_p0  ;;  %p3678_p1 = por %p3677_p3, %p3676_p13 }
  0x3a   : > { %p3672_p10 = pneg %p3671_p7 }
  0x3c   : > { %p3679_p2 = pnand %p3678_p1, %p3672_p10 }
  0x3e   : > { %3682 = shalt.err (!%p3679_p2)
}
  0x3f   : > { %3530 = dma.hbm_to_vmem [thread:$0]  (!%p3947_p12), %s4678_s2, 4096, %s3951_s10, [#allocation9], %s3850_s30, %s3850_s30, %s3851_s9  }
  0x40   : > { %s3683_s16 = scalar_lea.hbm %s4679_s3, 4096 }
  0x41   : > { %p3684_p6 = scmp.ne.s32.totalorder %s4679_s3, %s3683_s16  ;;  %p3690_p5 = scmp.lt.u32.totalorder %s3683_s16, %s4679_s3 }
  0x43   : > { %p3686_p8 = pnand %p3684_p6, %p3963_p0 }
  0x45   : > { %p3687_p11 = pneg %p3686_p8 }
  0x47   : > { %p3692_p7 = pnand %p3690_p5, %p3687_p11 }
  0x49   : > { %3695 = shalt.err (!%p3692_p7)
}
  0x4a   : > { %s3696_s7 = scalar_lea.vmem %s227_s12, 4096  ;;  %p3704_p1 = scmp.lt.s32.totalorder %s227_s12, %s227_s12 }
  0x4b   : > { %p3697_p10 = scmp.ne.s32.totalorder %s227_s12, %s3696_s7  ;;  %p3705_p2 = scmp.lt.s32.totalorder %s3696_s7, %s3696_s7 }
  0x4d   : > { %p3699_p13 = pnand %p3697_p10, %p3963_p0  ;;  %p3706_p4 = por %p3705_p2, %p3704_p1 }
  0x4f   : > { %p3700_p3 = pneg %p3699_p13 }
  0x51   : > { %p3707_p9 = pnand %p3706_p4, %p3700_p3 }
  0x53   : > { %3710 = shalt.err (!%p3707_p9)
}
  0x54   : > { %3533 = dma.hbm_to_vmem [thread:$0]  (!%p3947_p12), %s4679_s3, 4096, %s227_s12, [#allocation12], %s3850_s30, %s3850_s30, %s3851_s9  }
  0x55   : > { %s4036_s18 = sadd.s32 1, %s3845_s24   ;;  %s33_s13 = sadd.s32 1, %s3841_s23 }
  0x56   : > { %s30_s8 = ssub.s32 %s3845_s24, %s4036_s18  ;;  %p40_p9 = scmp.ne.s32.totalorder %s3841_s23, %s3837_s22 }
  0x57   : > { %p31_p4 = scmp.eq.s32.totalorder %s30_s8, 0  ;;  %p41_p0 = scmp.eq.s32.totalorder %s3845_s24, 0 }
  0x58   : > { %p3545_p6 = scmp.lt.s32.totalorder %s3845_s24, 2  ;;  %p4691_p11 = scmp.eq.s32.totalorder %s3916_s25, 1 }
  0x59   : > { %s4046_s14 = scalar_select %p31_p4, %s3841_s23, %s33_s13  }
  0x5a   : > { %p42_p8 = por %p41_p0, %p40_p9  ;;  %p4050_p5 = por %p4691_p11, %p40_p9 }
  0x5b   : > { %s243_s16 = sand.u32 1, %s3841_s23   ;;  %s2086_s17 = sshll.u32 %s3845_s24, 10 }
  0x5c   : > { %s2065_s12 = sshll.u32 %s243_s16, 6  ;;  %s4059_s26 = scalar_lea.hbm %s4676_s0, %s2086_s17 }
  0x5d   : > { %s247_s7 = scalar_lea.vmem [#allocation5], %s2065_s12  ;;  %p4061_p12 = pnand %p3545_p6, %p42_p8 }
  0x5e   : > { %s254_s10 = sshll.u32 %s247_s7, 4  ;;  %s4067_s8 = scalar_lea.sflag [#allocation6], %s243_s16  ;;  %s4065_s10 = int_to_ptr.vmem [resolvable:$true] %s254_s10 }
  0x5f   : > { %s3711_s13 = scalar_lea.hbm %s4059_s26, 1024  ;;  %p3713_p10 = pneg %p4061_p12 }
  0x60   : > { %p3712_p7 = scmp.ne.s32.totalorder %s4059_s26, %s3711_s13  ;;  %s3716_s19 = scalar_lea.hbm %s4676_s0, 2048 }
  0x61   : > { %p3717_p1 = scmp.lt.u32.totalorder %s4059_s26, %s4676_s0  ;;  %p3718_p2 = scmp.lt.u32.totalorder %s3716_s19, %s3711_s13 }
  0x62   : > { %p3714_p13 = pnand %p3713_p10, %p3712_p7  ;;  %p3720_p9 = scmp.lt.u32.totalorder %s3711_s13, %s4059_s26 }
  0x63   : > { %p3719_p4 = por %p3718_p2, %p3717_p1 }
  0x64   : > { %p3715_p3 = pneg %p3714_p13 }
  0x65   : > { %p3721_p0 = por %p3720_p9, %p3719_p4 }
  0x67   : > { %p3722_p6 = pnand %p3721_p0, %p3715_p3 }
  0x69   : > { %3725 = shalt.err (!%p3722_p6)
}
  0x6a   : > { %s3726_s16 = scalar_lea.vmem %s4065_s10, 1024  ;;  %s3852_s17 = smov [#allocation5]  }
  0x6b   : > { %p3727_p8 = scmp.ne.s32.totalorder %s4065_s10, %s3726_s16  ;;  %s3731_s12 = sshll.u32 %s3852_s17, 4  ;;  %s3732_s12 = int_to_ptr.vmem [resolvable:$false] %s3731_s12 }
  0x6c   : > { %s3733_s20 = scalar_lea.vmem %s3732_s12, 2048  ;;  %p3734_p13 = scmp.lt.s32.totalorder %s4065_s10, %s3732_s12 }
  0x6d   : > { %p3729_p11 = pnand %p3727_p8, %p3713_p10  ;;  %p3735_p1 = scmp.lt.s32.totalorder %s3733_s20, %s3726_s16 }
  0x6f   : > { %p3730_p7 = pneg %p3729_p11  ;;  %p3736_p2 = por %p3735_p1, %p3734_p13 }
  0x71   : > { %p3737_p4 = pnand %p3736_p2, %p3730_p7 }
  0x73   : > { %3740 = shalt.err (!%p3737_p4)
}
  0x74   : > { %3537 = dma.hbm_to_vmem [thread:$0]  (!%p4061_p12), %s4059_s26, 1024, %s4065_s10, %s4067_s8, %s3850_s30, %s3850_s30, %s3851_s9  }
  0x75   : > { %p4694_p10 = scmp.ne.s32.totalorder %s4688_s29, 0 }
  0x76   : > { %s4101_s13 = sand.u32 (!%p4694_p10), 1, %s3837_s22   ;;  %p4695_p3 = scmp.ne.s32.totalorder (!%p4694_p10), %s4686_s27, 0 }
  0x77   : > { %266 = sbr.rel (%p4694_p10) target bundleno = 3651 (0xe43), region = 40  ;;  %s2069_s19 = sshll.u32 (!%p4694_p10), %s4101_s13, 6 }
  0x78   : > { %s269_s7 = scalar_lea.sflag (!%p4694_p10), [#allocation6], %s4101_s13  ;;  %s4105_s16 = scalar_lea.vmem (!%p4694_p10), [#allocation5], %s2069_s19 }
  0x7e   : > { %3812 = dma.done.wait (%p4695_p3), %s269_s7, 1024  }
  0x7f   : > { %3814 = vsyncadd (%p4695_p3), %s269_s7, 4294966272  ;;  %p4696_p12 = scmp.eq.s32.totalorder %s3916_s25, 0 }
  0x81   : > { %3816 = dma.done.wait (%p4696_p12), [#allocation9], 4352   ;;  %p4697_p9 = pmov %p4696_p12 }
  0x83   : > { %3818 = vsyncadd (%p4697_p9), [#allocation9], 4294962944  ;;  %p4698_p0 = pmov %p4697_p9 }
  0x85   : > { %3820 = dma.done.wait (%p4698_p0), [#allocation12], 4096   ;;  %p4699_p6 = pmov %p4698_p0 }
  0x86   : > { %s4119_s29 = scalar_lea.vmem [#allocation13], %s2069_s19  ;;  %p4700_p8 = scmp.ne.s32.totalorder %s3916_s25, 0 }
  0x87   : > { %3822 = vsyncadd (%p4699_p6), [#allocation12], 4294963200  ;;  %v317_v0 = vld [vmem:[#allocation8] sm:$0xff] (!%p4700_p8)  ;;  %v318_v1 = vld [vmem:[#allocation8 + $0x8] sm:$0xff] (!%p4700_p8) }
  0x88   : > { %316 = sbr.rel (%p4700_p8) target bundleno = 143 (0x8f), region = 60  ;;  %319 = vst [vmem:[#allocation2] sm:$0xff] (!%p4700_p8), %v317_v0  ;;  %320 = vst [vmem:[#allocation2 + $0x8] sm:$0xff] (!%p4700_p8), %v318_v1 }
  0x8f PF: > { %v345_v2 = vld [vmem:[#allocation10] sm:$0xff]  ;;  %v346_v3 = vld [vmem:[#allocation10 + $0x8] sm:$0xff]  ;;  %v3853_v6 = vmov 0.0|0.0   ;;  %v347_v8 = vld [vmem:[#allocation10 + $0x10] sm:$0xff]  ;;  %vm3854_vm0 = vmmov 0   ;;  %v3855_v10 = vmov 0.0  }
  0x90   : > { %v481_v4 = vld [vmem:[#allocation11] sm:$0xff]  ;;  %v3056_v5 = vpack.c.bf16 %v346_v3, %v345_v2  ;;  %3088 = vmatprep.subr.bf16.mxu1 %v3853_v6  ;;  %v482_v7 = vld [vmem:[#allocation11 + $0x8] sm:$0xff]  ;;  %v348_v9 = vld [vmem:[#allocation10 + $0x18] sm:$0xff]  ;;  %2484 = vmatprep.mubr.msk.f32.mxu1 %vm3854_vm0, %v3855_v10  ;;  %p2078_p11 = scmp.ne.s32.totalorder %s3916_s25, 1 }
  0x91   : > { %v4126_v11 = vpack.c.bf16 %v482_v7, %v481_v4  ;;  %v3060_v12 = vpack.c.bf16 %v348_v9, %v347_v8  ;;  %v483_v13 = vld [vmem:[#allocation11 + $0x10] sm:$0xff]  ;;  %v484_v14 = vld [vmem:[#allocation11 + $0x18] sm:$0xff]  ;;  %v349_v15 = vld [vmem:[#allocation10 + $0x20] sm:$0xff] }
  0x92   : > { %3057 = vmatprep.subr.bf16.mxu0 %v3056_v5  ;;  %v350_v16 = vld [vmem:[#allocation10 + $0x28] sm:$0xff]  ;;  %v4129_v17 = vpack.c.bf16 %v484_v14, %v483_v13  ;;  %v485_v19 = vld [vmem:[#allocation11 + $0x20] sm:$0xff]  ;;  %v351_v21 = vld [vmem:[#allocation10 + $0x30] sm:$0xff] }
  0x93   : > { %3059 = vmatpush3.bf16.msra.mxu0 %v3056_v5  ;;  %3090 = vmatpush3.bf16.msra.mxu1 %v4126_v11  ;;  %v3064_v18 = vpack.c.bf16 %v350_v16, %v349_v15  ;;  %v486_v20 = vld [vmem:[#allocation11 + $0x28] sm:$0xff]  ;;  %v352_v22 = vld [vmem:[#allocation10 + $0x38] sm:$0xff]  ;;  %v487_v25 = vld [vmem:[#allocation11 + $0x30] sm:$0xff] }
  0x94   : > { %3061 = vmatprep.subr.bf16.mxu0 %v3060_v12  ;;  %3091 = vmatprep.subr.bf16.mxu1 %v3853_v6  ;;  %v4133_v23 = vpack.c.bf16 %v486_v20, %v485_v19  ;;  %v3068_v24 = vpack.c.bf16 %v352_v22, %v351_v21  ;;  %v488_v26 = vld [vmem:[#allocation11 + $0x38] sm:$0xff]  ;;  %v353_v27 = vld [vmem:[#allocation10 + $0x40] sm:$0xff]  ;;  %v354_v28 = vld [vmem:[#allocation10 + $0x48] sm:$0xff] }
  0x95   : > { %v4137_v29 = vld [vmem:[%s4105_s16] sm:$0xff]  ;;  %v4141_v30 = vpack.c.bf16 %v488_v26, %v487_v25  ;;  %v3072_v31 = vpack.c.bf16 %v354_v28, %v353_v27  ;;  %v489_v32 = vld [vmem:[#allocation11 + $0x40] sm:$0xff]  ;;  %v490_v33 = vld [vmem:[#allocation11 + $0x48] sm:$0xff] }
  0x96   : > { %2440 = vmatprep.mubr.f32.mxu0 %v4137_v29  ;;  %v355_v34 = vld [vmem:[#allocation10 + $0x50] sm:$0xff]  ;;  %v356_v35 = vld [vmem:[#allocation10 + $0x58] sm:$0xff]  ;;  %v4145_v36 = vpack.c.bf16 %v490_v33, %v489_v32  ;;  %v357_v40 = vld [vmem:[#allocation10 + $0x60] sm:$0xff] }
  0x97   : > { %3063 = vmatpush3.bf16.msra.mxu0 %v3060_v12  ;;  %3093 = vmatpush3.bf16.msra.mxu1 %v4129_v17  ;;  %v3076_v37 = vpack.c.bf16 %v356_v35, %v355_v34  ;;  %v491_v38 = vld [vmem:[#allocation11 + $0x50] sm:$0xff]  ;;  %v492_v39 = vld [vmem:[#allocation11 + $0x58] sm:$0xff]  ;;  %v358_v41 = vld [vmem:[#allocation10 + $0x68] sm:$0xff] }
  0x98   : > { %3065 = vmatprep.subr.bf16.mxu0 %v3064_v18  ;;  %3094 = vmatprep.subr.bf16.mxu1 %v3853_v6  ;;  %v4149_v42 = vpack.c.bf16 %v492_v39, %v491_v38  ;;  %v3080_v43 = vpack.c.bf16 %v358_v41, %v357_v40  ;;  %v493_v44 = vld [vmem:[#allocation11 + $0x60] sm:$0xff]  ;;  %v494_v45 = vld [vmem:[#allocation11 + $0x68] sm:$0xff]  ;;  %v359_v46 = vld [vmem:[#allocation10 + $0x70] sm:$0xff] }
  0x99   : > { %v360_v47 = vld [vmem:[#allocation10 + $0x78] sm:$0xff]  ;;  %v4153_v48 = vpack.c.bf16 %v494_v45, %v493_v44  ;;  %v495_v50 = vld [vmem:[#allocation11 + $0x70] sm:$0xff]  ;;  %v497_v54 = vld [vmem:[#allocation2] sm:$0xff] }
  0x9a   : > { %v3084_v49 = vpack.c.bf16 %v360_v47, %v359_v46  ;;  %v496_v51 = vld [vmem:[#allocation11 + $0x78] sm:$0xff]  ;;  %v4202_v55 = vld [vmem:[%s4105_s16 + $0x10] sm:$0xff]  ;;  %v4206_v56 = vld [vmem:[%s4105_s16 + $0x18] sm:$0xff] }
  0x9b   : > { %3067 = vmatpush3.bf16.msra.mxu0 %v3064_v18  ;;  %3096 = vmatpush3.bf16.msra.mxu1 %v4133_v23  ;;  %v4157_v52 = vpack.c.bf16 %v496_v51, %v495_v50  ;;  %v4162_v53 = vld [vmem:[%s4105_s16 + $0x8] sm:$0xff]  ;;  %v4210_v57 = vld [vmem:[%s4105_s16 + $0x20] sm:$0xff]  ;;  %v4216_v59 = vld [vmem:[%s4105_s16 + $0x30] sm:$0xff] }
  0x9c   : > { %3069 = vmatprep.subr.bf16.mxu0 %v3068_v24  ;;  %3097 = vmatprep.subr.bf16.mxu1 %v3853_v6  ;;  %v4213_v58 = vld [vmem:[%s4105_s16 + $0x28] sm:$0xff]  ;;  %v4222_v60 = vld [vmem:[%s4105_s16 + $0x38] sm:$0xff]  ;;  %v4230_v61 = vld [vmem:[%s4680_s4] ss:$0 sm:$0xff] }
  0x9d   : > { %v1132_v41 = vld [vmem:[#allocation10 + $0x90] sm:$0xff]  ;;  %v1134_v46 = vld [vmem:[#allocation10 + $0xa0] sm:$0xff]  ;;  %v1135_v47 = vld [vmem:[#allocation10 + $0xa8] sm:$0xff] }
  0x9e   : > { %v1137_v50 = vld [vmem:[#allocation10 + $0xb8] sm:$0xff] }
  0x9f   : > { %3071 = vmatpush3.bf16.msra.mxu0 %v3068_v24  ;;  %3099 = vmatpush3.bf16.msra.mxu1 %v4141_v30 }
  0xa0   : > { %3073 = vmatprep.subr.bf16.mxu0 %v3072_v31  ;;  %3100 = vmatprep.subr.bf16.mxu1 %v3853_v6 }
  0xa3   : > { %3075 = vmatpush3.bf16.msra.mxu0 %v3072_v31  ;;  %3102 = vmatpush3.bf16.msra.mxu1 %v4145_v36 }
  0xa4   : > { %3077 = vmatprep.subr.bf16.mxu0 %v3076_v37  ;;  %3103 = vmatprep.subr.bf16.mxu1 %v3853_v6 }
  0xa7   : > { %3079 = vmatpush3.bf16.msra.mxu0 %v3076_v37  ;;  %3105 = vmatpush3.bf16.msra.mxu1 %v4149_v42 }
  0xa8   : > { %3081 = vmatprep.subr.bf16.mxu0 %v3080_v43  ;;  %3106 = vmatprep.subr.bf16.mxu1 %v3853_v6 }
  0xab   : > { %3083 = vmatpush3.bf16.msra.mxu0 %v3080_v43  ;;  %3108 = vmatpush3.bf16.msra.mxu1 %v4153_v48 }
  0xac   : > { %3085 = vmatprep.subr.bf16.mxu0 %v3084_v49  ;;  %3109 = vmatprep.subr.bf16.mxu1 %v3853_v6 }
  0xaf   : > { %3087 = vmatpush3.bf16.msra.mxu0 %v3084_v49  ;;  %3111 = vmatpush3.bf16.msra.mxu1 %v4157_v52  ;;  %v1136_v49 = vld [vmem:[#allocation10 + $0xb0] sm:$0xff] }
  0xb0   : > { %3112 = vmatprep.subr.bf16.mxu0 %v3853_v6  ;;  %3136 = vmatprep.subr.bf16.mxu1 %v3853_v6  ;;  %v3292_v51 = vpack.c.bf16 %v1137_v50, %v1136_v49 }
  0xb2   : > { %2441 = vmatmul.mubr.f32.vlgmr.msra.gmra.mrb[0].mxu0 %v4162_v53  ;;  %2485 = vmatmul.mubr.f32.vlgmr.msra.gmra.mrb[0].mxu1 %v497_v54  ;;  %v1139_v54 = vld [vmem:[#allocation10 + $0xc8] sm:$0xff] }
  0xb3   : > { %3114 = vmatpush3.bf16.msra.mxu0 %v4126_v11  ;;  %3138 = vmatpush3.bf16.msra.mxu1 %v4126_v11 }
  0xb4   : > { %3115 = vmatprep.subr.bf16.mxu0 %v3853_v6  ;;  %3139 = vmatprep.subr.bf16.mxu1 %v3853_v6 }
  0xb5   : > { %2554 = vmatprep.mubr.msk.f32.mxu1 %vm3854_vm0, %v3855_v10  ;;  %2443 = vmatprep.mubr.f32.mxu0 %v4202_v55 }
  0xb6   : > { %2444 = vmatmul.mubr.f32.gmra.mrb[2].mxu0 %v4206_v56 }
  0xb7   : > { %3117 = vmatpush3.bf16.msra.mxu0 %v4129_v17  ;;  %3141 = vmatpush3.bf16.msra.mxu1 %v4129_v17 }
  0xb8   : > { %3118 = vmatprep.subr.bf16.mxu0 %v3853_v6  ;;  %3142 = vmatprep.subr.bf16.mxu1 %v3853_v6 }
  0xb9   : > { %2446 = vmatprep.mubr.f32.mxu0 %v4210_v57 }
  0xba   : > { %2447 = vmatmul.mubr.f32.gmra.mrb[4].mxu0 %v4213_v58 }
  0xbb   : > { %3120 = vmatpush3.bf16.msra.mxu0 %v4133_v23  ;;  %3144 = vmatpush3.bf16.msra.mxu1 %v4133_v23 }
  0xbc   : > { %3121 = vmatprep.subr.bf16.mxu0 %v3853_v6  ;;  %3145 = vmatprep.subr.bf16.mxu1 %v3853_v6 }
  0xbd   : > { %2449 = vmatprep.mubr.f32.mxu0 %v4216_v59 }
  0xbe   : > { %2450 = vmatmul.mubr.f32.gmra.mrb[6].mxu0 %v4222_v60 }
  0xbf   : > { %3123 = vmatpush3.bf16.msra.mxu0 %v4141_v30  ;;  %3147 = vmatpush3.bf16.msra.mxu1 %v4141_v30 }
  0xc0   : > { %3124 = vmatprep.subr.bf16.mxu0 %v3853_v6  ;;  %3148 = vmatprep.subr.bf16.mxu1 %v3853_v6 }
  0xc1   : > { %2519 = vmatprep.mubr.msk.f32.mxu0 %vm3854_vm0, %v3855_v10 }
  0xc3   : > { %3126 = vmatpush3.bf16.msra.mxu0 %v4145_v36  ;;  %3150 = vmatpush3.bf16.msra.mxu1 %v4145_v36 }
  0xc4   : > { %3127 = vmatprep.subr.bf16.mxu0 %v3853_v6  ;;  %3151 = vmatprep.subr.bf16.mxu1 %v3853_v6 }
  0xc7   : > { %3129 = vmatpush3.bf16.msra.mxu0 %v4149_v42  ;;  %3153 = vmatpush3.bf16.msra.mxu1 %v4149_v42 }
  0xc8   : > { %3130 = vmatprep.subr.bf16.mxu0 %v3853_v6  ;;  %3154 = vmatprep.subr.bf16.mxu1 %v3853_v6 }
  0xcb   : > { %3132 = vmatpush3.bf16.msra.mxu0 %v4153_v48  ;;  %3156 = vmatpush3.bf16.msra.mxu1 %v4153_v48 }
  0xcc   : > { %3133 = vmatprep.subr.bf16.mxu0 %v3853_v6  ;;  %3157 = vmatprep.subr.bf16.mxu1 %v3853_v6 }
  0xcf   : > { %3135 = vmatpush3.bf16.msra.mxu0 %v4157_v52  ;;  %3159 = vmatpush3.bf16.msra.mxu1 %v4157_v52 }
  0xd0   : > { %3160 = vmatprep.subr.bf16.mxu0 %v3853_v6  ;;  %3184 = vmatprep.subr.bf16.mxu1 %v3853_v6 }
 0x185   : > { %v2442_v62 = vpop.f32.mrb[0].mxu0  ;;  %v565_v63 = vpop.f32.mrb[0].mxu1 }
 0x186   : > { %v434_v0 = vpop.f32.mrb[1].mxu0  ;;  %v2486_v1 = vpop.f32.mrb[1].mxu1  ;;  %v440_v14 = vadd.f32 %v2442_v62, %v4230_v61 }
 0x187   : > { %v435_v2 = vadd.f32 %v4230_v61, %v434_v0  ;;  %v1142_v1 = vld [vmem:[#allocation10 + $0xe0] sm:$0xff] }
 0x189   : > { %v569_v3 = vadd.f32 %v565_v63, %v435_v2  ;;  %v2445_v5 = vpop.f32.mrb[2].mxu0  ;;  %v1141_v63 = vld [vmem:[#allocation10 + $0xd8] sm:$0xff]  ;;  %v1143_v2 = vld [vmem:[#allocation10 + $0xe8] sm:$0xff] }
 0x18a   : > { %v444_v7 = vpop.f32.mrb[3].mxu0  ;;  %v450_v26 = vadd.f32 %v2445_v5, %v4230_v61  ;;  %v1145_v5 = vld [vmem:[#allocation10 + $0xf8] sm:$0xff] }
 0x18b   : > { %3595 = vtanh.f32 %v569_v3  ;;  %v445_v20 = vadd.f32 %v4230_v61, %v444_v7  ;;  %v3304_v3 = vpack.c.bf16 %v1143_v2, %v1142_v1 }
 0x18d   : > { %v4254_v8 = vpop.f32.mrb[4].mxu0 }
 0x18e   : > { %v4256_v9 = vpop.f32.mrb[5].mxu0 }
 0x18f   : > { %v455_v33 = vadd.f32 %v4230_v61, %v4256_v9 }
 0x191   : > { %v4258_v12 = vpop.f32.mrb[6].mxu0 }
 0x192   : > { %v4260_v13 = vpop.f32.mrb[7].mxu0 }
 0x195   : > { %v4233_v4 = vpop.eup %3595 }
 0x196   : > { %2520 = vmatmul.mubr.f32.vlgmr.msra.gmra.mrb[8].mxu0 %v4233_v4  ;;  %v4354_v45 = vadd.f32 %v4233_v4, %v4137_v29  ;;  %v1140_v29 = vld [vmem:[#allocation10 + $0xd0] sm:$0xff] }
 0x197   : > { %3162 = vmatpush3.bf16.msra.mxu0 %v4126_v11  ;;  %2589 = vmatprep.mubr.msk.f32.mxu0 %vm3854_vm0, %v3855_v10  ;;  %v3300_v0 = vpack.c.bf16 %v1141_v63, %v1140_v29  ;;  %v1144_v4 = vld [vmem:[#allocation10 + $0xf0] sm:$0xff] }
 0x198   : > { %3163 = vmatprep.subr.bf16.mxu0 %v3853_v6  ;;  %v3308_v7 = vpack.c.bf16 %v1145_v5, %v1144_v4 }
 0x19b   : > { %3165 = vmatpush3.bf16.msra.mxu0 %v4129_v17 }
 0x19c   : > { %3166 = vmatprep.subr.bf16.mxu0 %v3853_v6 }
 0x19f   : > { %3168 = vmatpush3.bf16.msra.mxu0 %v4133_v23 }
 0x1a0   : > { %3169 = vmatprep.subr.bf16.mxu0 %v3853_v6 }
 0x1a3   : > { %3171 = vmatpush3.bf16.msra.mxu0 %v4141_v30 }
 0x1a4   : > { %3172 = vmatprep.subr.bf16.mxu0 %v3853_v6 }
 0x1a7   : > { %3174 = vmatpush3.bf16.msra.mxu0 %v4145_v36 }
 0x1a8   : > { %3175 = vmatprep.subr.bf16.mxu0 %v3853_v6 }
 0x1ab   : > { %3177 = vmatpush3.bf16.msra.mxu0 %v4149_v42 }
 0x1ac   : > { %3178 = vmatprep.subr.bf16.mxu0 %v3853_v6 }
 0x1af   : > { %3180 = vmatpush3.bf16.msra.mxu0 %v4153_v48 }
 0x1b0   : > { %3181 = vmatprep.subr.bf16.mxu0 %v3853_v6 }
 0x1b3   : > { %3183 = vmatpush3.bf16.msra.mxu0 %v4157_v52 }
 0x1b4   : > { %3208 = vmatprep.subr.bf16.mxu0 %v3853_v6 }
 0x269   : > { %v642_v15 = vpop.f32.mrb[8].mxu0 }
 0x26a   : > { %v646_v16 = vadd.f32 %v642_v15, %v440_v14  ;;  %v2521_v18 = vpop.f32.mrb[9].mxu0 }
 0x26c   : > { %3597 = vtanh.f32 %v646_v16  ;;  %v1269_v16 = vld [vmem:[#allocation11 + $0x88] sm:$0xff] }
 0x276   : > { %v4263_v19 = vpop.eup %3597 }
 0x277   : > { %2555 = vmatmul.mubr.f32.vlgmr.msra.gmra.mrb[2].mxu1 %v4263_v19 }
 0x278   : > { %3186 = vmatpush3.bf16.msra.mxu1 %v4126_v11  ;;  %2624 = vmatprep.mubr.msk.f32.mxu1 %vm3854_vm0, %v3855_v10 }
 0x279   : > { %3187 = vmatprep.subr.bf16.mxu1 %v3853_v6 }
 0x27c   : > { %3189 = vmatpush3.bf16.msra.mxu1 %v4129_v17 }
 0x27d   : > { %3190 = vmatprep.subr.bf16.mxu1 %v3853_v6 }
 0x280   : > { %3192 = vmatpush3.bf16.msra.mxu1 %v4133_v23 }
 0x281   : > { %3193 = vmatprep.subr.bf16.mxu1 %v3853_v6 }
 0x284   : > { %3195 = vmatpush3.bf16.msra.mxu1 %v4141_v30 }
 0x285   : > { %3196 = vmatprep.subr.bf16.mxu1 %v3853_v6 }
 0x288   : > { %3198 = vmatpush3.bf16.msra.mxu1 %v4145_v36 }
 0x289   : > { %3199 = vmatprep.subr.bf16.mxu1 %v3853_v6 }
 0x28c   : > { %3201 = vmatpush3.bf16.msra.mxu1 %v4149_v42 }
 0x28d   : > { %3202 = vmatprep.subr.bf16.mxu1 %v3853_v6 }
 0x290   : > { %3204 = vmatpush3.bf16.msra.mxu1 %v4153_v48 }
 0x291   : > { %3205 = vmatprep.subr.bf16.mxu1 %v3853_v6 }
 0x294   : > { %3207 = vmatpush3.bf16.msra.mxu1 %v4157_v52 }
 0x295   : > { %3232 = vmatprep.subr.bf16.mxu1 %v3853_v6 }
 0x34a   : > { %v720_v21 = vpop.f32.mrb[2].mxu1 }
 0x34b   : > { %v724_v22 = vadd.f32 %v720_v21, %v445_v20  ;;  %v2556_v24 = vpop.f32.mrb[3].mxu1  ;;  %v1272_v20 = vld [vmem:[#allocation11 + $0xa0] sm:$0xff]  ;;  %v1273_v21 = vld [vmem:[#allocation11 + $0xa8] sm:$0xff] }
 0x34c   : > { %v1275_v24 = vld [vmem:[#allocation11 + $0xb8] sm:$0xff] }
 0x34d   : > { %3599 = vtanh.f32 %v724_v22  ;;  %v1274_v22 = vld [vmem:[#allocation11 + $0xb0] sm:$0xff] }
 0x357   : > { %v4285_v25 = vpop.eup %3599 }
 0x358   : > { %2590 = vmatmul.mubr.f32.vlgmr.msra.gmra.mrb[10].mxu0 %v4285_v25  ;;  %v4364_v9 = vadd.f32 %v4285_v25, %v4202_v55  ;;  %v1268_v55 = vld [vmem:[#allocation11 + $0x80] sm:$0xff]  ;;  %v4394_v25 = vpack.c.bf16 %v1275_v24, %v1274_v22 }
 0x359   : > { %3210 = vmatpush3.bf16.msra.mxu0 %v4126_v11  ;;  %2659 = vmatprep.mubr.msk.f32.mxu0 %vm3854_vm0, %v3855_v10  ;;  %v4382_v18 = vpack.c.bf16 %v1269_v16, %v1268_v55 }
 0x35a   : > { %3211 = vmatprep.subr.bf16.mxu0 %v3853_v6 }
 0x35d   : > { %3213 = vmatpush3.bf16.msra.mxu0 %v4129_v17 }
 0x35e   : > { %3214 = vmatprep.subr.bf16.mxu0 %v3853_v6 }
 0x361   : > { %3216 = vmatpush3.bf16.msra.mxu0 %v4133_v23 }
 0x362   : > { %3217 = vmatprep.subr.bf16.mxu0 %v3853_v6 }
 0x365   : > { %3219 = vmatpush3.bf16.msra.mxu0 %v4141_v30 }
 0x366   : > { %3220 = vmatprep.subr.bf16.mxu0 %v3853_v6 }
 0x369   : > { %3222 = vmatpush3.bf16.msra.mxu0 %v4145_v36 }
 0x36a   : > { %3223 = vmatprep.subr.bf16.mxu0 %v3853_v6 }
 0x36d   : > { %3225 = vmatpush3.bf16.msra.mxu0 %v4149_v42 }
 0x36e   : > { %3226 = vmatprep.subr.bf16.mxu0 %v3853_v6 }
 0x371   : > { %3228 = vmatpush3.bf16.msra.mxu0 %v4153_v48 }
 0x372   : > { %3229 = vmatprep.subr.bf16.mxu0 %v3853_v6 }
 0x375   : > { %3231 = vmatpush3.bf16.msra.mxu0 %v4157_v52 }
 0x376   : > { %3256 = vmatprep.subr.bf16.mxu0 %v3853_v6 }
 0x42b   : > { %v798_v27 = vpop.f32.mrb[10].mxu0 }
 0x42c   : > { %v802_v28 = vadd.f32 %v798_v27, %v450_v26  ;;  %v2591_v31 = vpop.f32.mrb[11].mxu0  ;;  %v1276_v26 = vld [vmem:[#allocation11 + $0xc0] sm:$0xff]  ;;  %v1277_v27 = vld [vmem:[#allocation11 + $0xc8] sm:$0xff] }
 0x42d   : > { %v1278_v31 = vld [vmem:[#allocation11 + $0xd0] sm:$0xff] }
 0x42e   : > { %3601 = vtanh.f32 %v802_v28  ;;  %v4398_v28 = vpack.c.bf16 %v1277_v27, %v1276_v26 }
 0x438   : > { %v4307_v32 = vpop.eup %3601 }
 0x439   : > { %2625 = vmatmul.mubr.f32.vlgmr.msra.gmra.mrb[4].mxu1 %v4307_v32  ;;  %v4370_v14 = vadd.f32 %v4307_v32, %v4206_v56  ;;  %v1270_v56 = vld [vmem:[#allocation11 + $0x90] sm:$0xff]  ;;  %v1279_v32 = vld [vmem:[#allocation11 + $0xd8] sm:$0xff] }
 0x43a   : > { %3234 = vmatpush3.bf16.msra.mxu1 %v4126_v11  ;;  %2694 = vmatprep.mubr.msk.f32.mxu1 %vm3854_vm0, %v3855_v10 }
 0x43b   : > { %3235 = vmatprep.subr.bf16.mxu1 %v3853_v6 }
 0x43e   : > { %3237 = vmatpush3.bf16.msra.mxu1 %v4129_v17 }
 0x43f   : > { %3238 = vmatprep.subr.bf16.mxu1 %v3853_v6 }
 0x442   : > { %3240 = vmatpush3.bf16.msra.mxu1 %v4133_v23 }
 0x443   : > { %3241 = vmatprep.subr.bf16.mxu1 %v3853_v6 }
 0x446   : > { %3243 = vmatpush3.bf16.msra.mxu1 %v4141_v30 }
 0x447   : > { %3244 = vmatprep.subr.bf16.mxu1 %v3853_v6 }
 0x44a   : > { %3246 = vmatpush3.bf16.msra.mxu1 %v4145_v36 }
 0x44b   : > { %3247 = vmatprep.subr.bf16.mxu1 %v3853_v6 }
 0x44e   : > { %3249 = vmatpush3.bf16.msra.mxu1 %v4149_v42 }
 0x44f   : > { %3250 = vmatprep.subr.bf16.mxu1 %v3853_v6 }
 0x452   : > { %3252 = vmatpush3.bf16.msra.mxu1 %v4153_v48 }
 0x453   : > { %3253 = vmatprep.subr.bf16.mxu1 %v3853_v6 }
 0x456   : > { %3255 = vmatpush3.bf16.msra.mxu1 %v4157_v52 }
 0x50c   : > { %v876_v34 = vpop.f32.mrb[4].mxu1 }
 0x50d   : > { %v880_v35 = vadd.f32 %v876_v34, %v455_v33  ;;  %v2626_v37 = vpop.f32.mrb[5].mxu1  ;;  %v4402_v33 = vpack.c.bf16 %v1279_v32, %v1278_v31  ;;  %v1280_v34 = vld [vmem:[#allocation11 + $0xe0] sm:$0xff] }
 0x50f   : > { %3603 = vtanh.f32 %v880_v35  ;;  %v1281_v35 = vld [vmem:[#allocation11 + $0xe8] sm:$0xff] }
 0x510   : > { %v4406_v37 = vpack.c.bf16 %v1281_v35, %v1280_v34 }
 0x519   : > { %v4329_v38 = vpop.eup %3603 }
 0x51a   : > { %2660 = vmatmul.mubr.f32.vlgmr.msra.gmra.mrb[12].mxu0 %v4329_v38  ;;  %v4374_v15 = vadd.f32 %v4329_v38, %v4210_v57  ;;  %v1282_v38 = vld [vmem:[#allocation11 + $0xf0] sm:$0xff] }
 0x51b   : > { %3258 = vmatpush3.bf16.msra.mxu0 %v4126_v11  ;;  %2729 = vmatprep.mubr.msk.f32.mxu0 %vm3854_vm0, %v3855_v10  ;;  %v1130_v11 = vld [vmem:[#allocation10 + $0x80] sm:$0xff] }
 0x51c   : > { %3259 = vmatprep.subr.bf16.mxu0 %v3853_v6 }
 0x51f   : > { %3261 = vmatpush3.bf16.msra.mxu0 %v4129_v17  ;;  %v1131_v17 = vld [vmem:[#allocation10 + $0x88] sm:$0xff] }
 0x520   : > { %3262 = vmatprep.subr.bf16.mxu0 %v3853_v6 }
 0x523   : > { %3264 = vmatpush3.bf16.msra.mxu0 %v4133_v23  ;;  %v3280_v23 = vpack.c.bf16 %v1131_v17, %v1130_v11  ;;  %v1283_v11 = vld [vmem:[#allocation11 + $0xf8] sm:$0xff] }
 0x524   : > { %3265 = vmatprep.subr.bf16.mxu0 %v3853_v6  ;;  %v4410_v17 = vpack.c.bf16 %v1283_v11, %v1282_v38 }
 0x525   : > { %3281 = vmatprep.subr.bf16.mxu1 %v3280_v23 }
 0x527   : > { %3267 = vmatpush3.bf16.msra.mxu0 %v4141_v30  ;;  %v460_v30 = vadd.f32 %v4254_v8, %v4230_v61  ;;  %v4359_v8 = vadd.f32 %v4263_v19, %v4162_v53  ;;  %v1271_v19 = vld [vmem:[#allocation11 + $0x98] sm:$0xff] }
 0x528   : > { %3268 = vmatprep.subr.bf16.mxu0 %v3853_v6  ;;  %v4386_v57 = vpack.c.bf16 %v1271_v19, %v1270_v56 }
 0x52b   : > { %3270 = vmatpush3.bf16.msra.mxu0 %v4145_v36 }
 0x52c   : > { %3271 = vmatprep.subr.bf16.mxu0 %v3853_v6 }
 0x52f   : > { %3273 = vmatpush3.bf16.msra.mxu0 %v4149_v42  ;;  %v1133_v42 = vld [vmem:[#allocation10 + $0x98] sm:$0xff] }
 0x530   : > { %3274 = vmatprep.subr.bf16.mxu0 %v3853_v6  ;;  %v3284_v43 = vpack.c.bf16 %v1133_v42, %v1132_v41 }
 0x533   : > { %3276 = vmatpush3.bf16.msra.mxu0 %v4153_v48  ;;  %v3288_v48 = vpack.c.bf16 %v1135_v47, %v1134_v46  ;;  %v1285_v47 = vld [vmem:[#allocation2 + $0x8] sm:$0xff] }
 0x534   : > { %3277 = vmatprep.subr.bf16.mxu0 %v3853_v6 }
 0x537   : > { %3279 = vmatpush3.bf16.msra.mxu0 %v4157_v52  ;;  %v1138_v52 = vld [vmem:[#allocation10 + $0xc0] sm:$0xff] }
 0x538   : > { %3312 = vmatprep.subr.bf16.mxu0 %v3853_v6  ;;  %v3296_v62 = vpack.c.bf16 %v1139_v54, %v1138_v52 }
 0x5ed   : > { %v954_v36 = vpop.f32.mrb[12].mxu0 }
 0x5ee   : > { %v958_v39 = vadd.f32 %v954_v36, %v460_v30  ;;  %v2661_v40 = vpop.f32.mrb[13].mxu0 }
 0x5f0   : > { %3605 = vtanh.f32 %v958_v39 }
 0x5fa   : > { %v3606_v44 = vpop.eup %3605 }
 0x5fb   : > { %2695 = vmatmul.mubr.f32.vlgmr.msra.gmra.mrb[6].mxu1 %v3606_v44  ;;  %v4379_v53 = vadd.f32 %v3606_v44, %v4213_v58  ;;  %v4390_v58 = vpack.c.bf16 %v1273_v21, %v1272_v20 }
 0x5fc   : > { %3283 = vmatpush3.bf16.msra.mxu1 %v3280_v23  ;;  %2764 = vmatprep.mubr.f32.mxu1 %v4354_v45  ;;  %v465_v23 = vadd.f32 %v4230_v61, %v4260_v13 }
 0x5fd   : > { %3285 = vmatprep.subr.bf16.mxu1 %v3284_v43 }
 0x600   : > { %3287 = vmatpush3.bf16.msra.mxu1 %v3284_v43 }
 0x601   : > { %3289 = vmatprep.subr.bf16.mxu1 %v3288_v48 }
 0x604   : > { %3291 = vmatpush3.bf16.msra.mxu1 %v3288_v48  ;;  %v470_v48 = vadd.f32 %v4258_v12, %v4230_v61 }
 0x605   : > { %3293 = vmatprep.subr.bf16.mxu1 %v3292_v51 }
 0x608   : > { %3295 = vmatpush3.bf16.msra.mxu1 %v3292_v51 }
 0x609   : > { %3297 = vmatprep.subr.bf16.mxu1 %v3296_v62 }
 0x60c   : > { %3299 = vmatpush3.bf16.msra.mxu1 %v3296_v62  ;;  %v4477_v62 = vld [vmem:[%s4680_s4 + $0x1] ss:$0 sm:$0xff] }
 0x60d   : > { %3301 = vmatprep.subr.bf16.mxu1 %v3300_v0 }
 0x610   : > { %3303 = vmatpush3.bf16.msra.mxu1 %v3300_v0 }
 0x611   : > { %3305 = vmatprep.subr.bf16.mxu1 %v3304_v3 }
 0x614   : > { %3307 = vmatpush3.bf16.msra.mxu1 %v3304_v3 }
 0x615   : > { %3309 = vmatprep.subr.bf16.mxu1 %v3308_v7 }
 0x618   : > { %3311 = vmatpush3.bf16.msra.mxu1 %v3308_v7 }
 0x619   : > { %3336 = vmatprep.subr.bf16.mxu1 %v3853_v6 }
 0x61b   : > { %2765 = vmatmul.mubr.f32.vlgmr.msra.gmra.mrb[8].mxu1 %v4359_v8 }
 0x61c   : > { %2767 = vmatprep.mubr.f32.mxu1 %v4364_v9  ;;  %3338 = vmatpush3.bf16.msra.mxu1 %v4382_v18 }
 0x61d   : > { %3339 = vmatprep.subr.bf16.mxu1 %v3853_v6 }
 0x61f   : > { %2768 = vmatmul.mubr.f32.gmra.mrb[10].mxu1 %v4370_v14 }
 0x620   : > { %2770 = vmatprep.mubr.f32.mxu1 %v4374_v15  ;;  %3341 = vmatpush3.bf16.msra.mxu1 %v4386_v57 }
 0x621   : > { %3342 = vmatprep.subr.bf16.mxu1 %v3853_v6 }
 0x623   : > { %2771 = vmatmul.mubr.f32.gmra.mrb[12].mxu1 %v4379_v53 }
 0x624   : > { %3344 = vmatpush3.bf16.msra.mxu1 %v4390_v58 }
 0x625   : > { %3345 = vmatprep.subr.bf16.mxu1 %v3853_v6 }
 0x628   : > { %3347 = vmatpush3.bf16.msra.mxu1 %v4394_v25 }
 0x629   : > { %3348 = vmatprep.subr.bf16.mxu1 %v3853_v6 }
 0x62c   : > { %3350 = vmatpush3.bf16.msra.mxu1 %v4398_v28 }
 0x62d   : > { %3351 = vmatprep.subr.bf16.mxu1 %v3853_v6 }
 0x630   : > { %3353 = vmatpush3.bf16.msra.mxu1 %v4402_v33 }
 0x631   : > { %3354 = vmatprep.subr.bf16.mxu1 %v3853_v6 }
 0x634   : > { %3356 = vmatpush3.bf16.msra.mxu1 %v4406_v37 }
 0x635   : > { %3357 = vmatprep.subr.bf16.mxu1 %v3853_v6 }
 0x638   : > { %3359 = vmatpush3.bf16.msra.mxu1 %v4410_v17 }
 0x639   : > { %3384 = vmatprep.subr.bf16.mxu1 %v3853_v6 }
 0x6ce   : > { %v1032_v30 = vpop.f32.mrb[6].mxu1 }
 0x6cf   : > { %v1036_v36 = vadd.f32 %v1032_v30, %v465_v23  ;;  %v2696_v39 = vpop.f32.mrb[7].mxu1 }
 0x6d1   : > { %3607 = vtanh.f32 %v1036_v36 }
 0x6db   : > { %v3608_v40 = vpop.eup %3607 }
 0x6dc   : > { %2730 = vmatmul.mubr.f32.vlgmr.msra.gmra.mrb[14].mxu0 %v3608_v40  ;;  %v4417_v41 = vadd.f32 %v3608_v40, %v4216_v59 }
 0x6dd   : > { %3314 = vmatpush3.bf16.msra.mxu0 %v4382_v18  ;;  %2808 = vmatprep.mubr.msk.f32.mxu0 %vm3854_vm0, %v3855_v10 }
 0x6de   : > { %2773 = vmatprep.mubr.f32.mxu1 %v4417_v41  ;;  %3315 = vmatprep.subr.bf16.mxu0 %v3853_v6 }
 0x6e1   : > { %3317 = vmatpush3.bf16.msra.mxu0 %v4386_v57 }
 0x6e2   : > { %3318 = vmatprep.subr.bf16.mxu0 %v3853_v6 }
 0x6e5   : > { %3320 = vmatpush3.bf16.msra.mxu0 %v4390_v58 }
 0x6e6   : > { %3321 = vmatprep.subr.bf16.mxu0 %v3853_v6 }
 0x6e9   : > { %3323 = vmatpush3.bf16.msra.mxu0 %v4394_v25 }
 0x6ea   : > { %3324 = vmatprep.subr.bf16.mxu0 %v3853_v6 }
 0x6ed   : > { %3326 = vmatpush3.bf16.msra.mxu0 %v4398_v28 }
 0x6ee   : > { %v4431_v59 = vpop.f32.mrb[8].mxu1  ;;  %3327 = vmatprep.subr.bf16.mxu0 %v3853_v6 }
 0x6ef   : > { %v1220_v13 = vpop.f32.mrb[9].mxu1  ;;  %v1226_v2 = vadd.f32 %v4431_v59, %v4477_v62 }
 0x6f0   : > { %v1221_v61 = vadd.f32 %v4477_v62, %v1220_v13 }
 0x6f1   : > { %3329 = vmatpush3.bf16.msra.mxu0 %v4402_v33 }
 0x6f2   : > { %v4435_v42 = vpop.f32.mrb[10].mxu1  ;;  %3330 = vmatprep.subr.bf16.mxu0 %v3853_v6 }
 0x6f3   : > { %v4438_v43 = vpop.f32.mrb[11].mxu1 }
 0x6f5   : > { %3332 = vmatpush3.bf16.msra.mxu0 %v4406_v37 }
 0x6f6   : > { %v4441_v44 = vpop.f32.mrb[12].mxu1  ;;  %3333 = vmatprep.subr.bf16.mxu0 %v3853_v6 }
 0x6f7   : > { %v4444_v46 = vpop.f32.mrb[13].mxu1 }
 0x6f9   : > { %3335 = vmatpush3.bf16.msra.mxu0 %v4410_v17 }
 0x6fa   : > { %3360 = vmatprep.subr.bf16.mxu0 %v3853_v6 }
 0x6fc   : > { %2809 = vmatmul.mubr.f32.vlgmr.msra.gmra.mrb[16].mxu0 %v1285_v47 }
 0x6fd   : > { %3362 = vmatpush3.bf16.msra.mxu0 %v4382_v18  ;;  %2878 = vmatprep.mubr.msk.f32.mxu0 %vm3854_vm0, %v3855_v10 }
 0x6fe   : > { %3363 = vmatprep.subr.bf16.mxu0 %v3853_v6 }
 0x701   : > { %3365 = vmatpush3.bf16.msra.mxu0 %v4386_v57 }
 0x702   : > { %3366 = vmatprep.subr.bf16.mxu0 %v3853_v6 }
 0x705   : > { %3368 = vmatpush3.bf16.msra.mxu0 %v4390_v58 }
 0x706   : > { %3369 = vmatprep.subr.bf16.mxu0 %v3853_v6 }
 0x709   : > { %3371 = vmatpush3.bf16.msra.mxu0 %v4394_v25 }
 0x70a   : > { %3372 = vmatprep.subr.bf16.mxu0 %v3853_v6 }
 0x70d   : > { %3374 = vmatpush3.bf16.msra.mxu0 %v4398_v28 }
 0x70e   : > { %3375 = vmatprep.subr.bf16.mxu0 %v3853_v6 }
 0x711   : > { %3377 = vmatpush3.bf16.msra.mxu0 %v4402_v33 }
 0x712   : > { %3378 = vmatprep.subr.bf16.mxu0 %v3853_v6 }
 0x715   : > { %3380 = vmatpush3.bf16.msra.mxu0 %v4406_v37 }
 0x716   : > { %3381 = vmatprep.subr.bf16.mxu0 %v3853_v6 }
 0x719   : > { %3383 = vmatpush3.bf16.msra.mxu0 %v4410_v17 }
 0x71a   : > { %3408 = vmatprep.subr.bf16.mxu0 %v3853_v6 }
 0x7af   : > { %v1110_v49 = vpop.f32.mrb[14].mxu0 }
 0x7b0   : > { %v1114_v50 = vadd.f32 %v1110_v49, %v470_v48  ;;  %v2731_v51 = vpop.f32.mrb[15].mxu0 }
 0x7b2   : > { %3609 = vtanh.f32 %v1114_v50 }
 0x7bc   : > { %v3610_v52 = vpop.eup %3609 }
 0x7bd   : > { %1120 = vst [vmem:[#allocation2] sm:$0xff] %v3610_v52  ;;  %v4469_v54 = vadd.f32 %v3610_v52, %v4222_v60 }
 0x7bf   : > { %2774 = vmatmul.mubr.f32.gmra.mrb[14].mxu1 %v4469_v54 }
 0x7c0   : > { %2843 = vmatprep.mubr.msk.f32.mxu1 %vm3854_vm0, %v3855_v10 }
 0x7c4   : > { %v1915_v13 = vld [vmem:[#allocation2] sm:$0xff] (!%p2078_p11) }
 0x7c5   : > { %1917 = vst [vmem:[#allocation14] sm:$0xff] (!%p2078_p11), %v1915_v13 }
 0x7cf   : > { %v1353_v12 = vpop.f32.mrb[16].mxu0 }
 0x7d0   : > { %v1357_v29 = vadd.f32 %v1353_v12, %v1221_v61  ;;  %v2810_v63 = vpop.f32.mrb[17].mxu0 }
 0x7d2   : > { %3611 = vtanh.f32 %v1357_v29 }
 0x7dc   : > { %v3612_v0 = vpop.eup %3611 }
 0x7dd   : > { %v1360_v60 = vadd.f32 %v3612_v0, %v4354_v45  ;;  %2844 = vmatmul.mubr.f32.vlgmr.msra.gmra.mrb[16].mxu1 %v3612_v0 }
 0x7de   : > { %3386 = vmatpush3.bf16.msra.mxu1 %v4382_v18  ;;  %2913 = vmatprep.mubr.msk.f32.mxu1 %vm3854_vm0, %v3855_v10 }
 0x7df   : > { %1903 = vst [vmem:[%s4119_s29] sm:$0xff] %v1360_v60  ;;  %3387 = vmatprep.subr.bf16.mxu1 %v3853_v6 }
 0x7e2   : > { %3389 = vmatpush3.bf16.msra.mxu1 %v4386_v57 }
 0x7e3   : > { %3390 = vmatprep.subr.bf16.mxu1 %v3853_v6 }
 0x7e6   : > { %3392 = vmatpush3.bf16.msra.mxu1 %v4390_v58 }
 0x7e7   : > { %3393 = vmatprep.subr.bf16.mxu1 %v3853_v6 }
 0x7ea   : > { %3395 = vmatpush3.bf16.msra.mxu1 %v4394_v25 }
 0x7eb   : > { %3396 = vmatprep.subr.bf16.mxu1 %v3853_v6 }
 0x7ee   : > { %3398 = vmatpush3.bf16.msra.mxu1 %v4398_v28 }
 0x7ef   : > { %3399 = vmatprep.subr.bf16.mxu1 %v3853_v6 }
 0x7f2   : > { %3401 = vmatpush3.bf16.msra.mxu1 %v4402_v33 }
 0x7f3   : > { %3402 = vmatprep.subr.bf16.mxu1 %v3853_v6 }
 0x7f6   : > { %3404 = vmatpush3.bf16.msra.mxu1 %v4406_v37 }
 0x7f7   : > { %3405 = vmatprep.subr.bf16.mxu1 %v3853_v6 }
 0x7fa   : > { %3407 = vmatpush3.bf16.msra.mxu1 %v4410_v17 }
 0x7fb   : > { %3432 = vmatprep.subr.bf16.mxu1 %v3853_v6 }
 0x892   : > { %v4500_v45 = vpop.f32.mrb[14].mxu1 }
 0x893   : > { %v4502_v1 = vpop.f32.mrb[15].mxu1  ;;  %v1256_v30 = vadd.f32 %v4500_v45, %v4477_v62 }
 0x8b0   : > { %v1429_v3 = vpop.f32.mrb[16].mxu1 }
 0x8b1   : > { %v1433_v4 = vadd.f32 %v1429_v3, %v1226_v2  ;;  %v2845_v5 = vpop.f32.mrb[17].mxu1 }
 0x8b3   : > { %3613 = vtanh.f32 %v1433_v4 }
 0x8bd   : > { %v3614_v7 = vpop.eup %3613 }
 0x8be   : > { %v1436_v55 = vadd.f32 %v3614_v7, %v4359_v8  ;;  %2879 = vmatmul.mubr.f32.vlgmr.msra.gmra.mrb[18].mxu0 %v3614_v7  ;;  %v1231_v8 = vadd.f32 %v4477_v62, %v4438_v43 }
 0x8bf   : > { %3410 = vmatpush3.bf16.msra.mxu0 %v4382_v18  ;;  %2948 = vmatprep.mubr.msk.f32.mxu0 %vm3854_vm0, %v3855_v10 }
 0x8c0   : > { %1904 = vst [vmem:[%s4119_s29 + $0x8] sm:$0xff] %v1436_v55  ;;  %3411 = vmatprep.subr.bf16.mxu0 %v3853_v6 }
 0x8c3   : > { %3413 = vmatpush3.bf16.msra.mxu0 %v4386_v57 }
 0x8c4   : > { %3414 = vmatprep.subr.bf16.mxu0 %v3853_v6 }
 0x8c7   : > { %3416 = vmatpush3.bf16.msra.mxu0 %v4390_v58 }
 0x8c8   : > { %3417 = vmatprep.subr.bf16.mxu0 %v3853_v6 }
 0x8cb   : > { %3419 = vmatpush3.bf16.msra.mxu0 %v4394_v25 }
 0x8cc   : > { %3420 = vmatprep.subr.bf16.mxu0 %v3853_v6 }
 0x8cf   : > { %3422 = vmatpush3.bf16.msra.mxu0 %v4398_v28 }
 0x8d0   : > { %3423 = vmatprep.subr.bf16.mxu0 %v3853_v6 }
 0x8d3   : > { %3425 = vmatpush3.bf16.msra.mxu0 %v4402_v33 }
 0x8d4   : > { %3426 = vmatprep.subr.bf16.mxu0 %v3853_v6 }
 0x8d7   : > { %3428 = vmatpush3.bf16.msra.mxu0 %v4406_v37 }
 0x8d8   : > { %3429 = vmatprep.subr.bf16.mxu0 %v3853_v6 }
 0x8db   : > { %3431 = vmatpush3.bf16.msra.mxu0 %v4410_v17 }
 0x8dc   : > { %3456 = vmatprep.subr.bf16.mxu0 %v3853_v6 }
 0x991   : > { %v1505_v16 = vpop.f32.mrb[18].mxu0 }
 0x992   : > { %v1509_v56 = vadd.f32 %v1505_v16, %v1231_v8  ;;  %v2880_v19 = vpop.f32.mrb[19].mxu0 }
 0x994   : > { %3615 = vtanh.f32 %v1509_v56 }
 0x99e   : > { %v3616_v20 = vpop.eup %3615 }
 0x99f   : > { %v1512_v21 = vadd.f32 %v3616_v20, %v4364_v9  ;;  %2914 = vmatmul.mubr.f32.vlgmr.msra.gmra.mrb[18].mxu1 %v3616_v20  ;;  %v1236_v9 = vadd.f32 %v4435_v42, %v4477_v62 }
 0x9a0   : > { %3434 = vmatpush3.bf16.msra.mxu1 %v4382_v18  ;;  %2983 = vmatprep.mubr.msk.f32.mxu1 %vm3854_vm0, %v3855_v10 }
 0x9a1   : > { %1905 = vst [vmem:[%s4119_s29 + $0x10] sm:$0xff] %v1512_v21  ;;  %3435 = vmatprep.subr.bf16.mxu1 %v3853_v6 }
 0x9a4   : > { %3437 = vmatpush3.bf16.msra.mxu1 %v4386_v57 }
 0x9a5   : > { %3438 = vmatprep.subr.bf16.mxu1 %v3853_v6 }
 0x9a8   : > { %3440 = vmatpush3.bf16.msra.mxu1 %v4390_v58 }
 0x9a9   : > { %3441 = vmatprep.subr.bf16.mxu1 %v3853_v6 }
 0x9ac   : > { %3443 = vmatpush3.bf16.msra.mxu1 %v4394_v25 }
 0x9ad   : > { %3444 = vmatprep.subr.bf16.mxu1 %v3853_v6 }
 0x9b0   : > { %3446 = vmatpush3.bf16.msra.mxu1 %v4398_v28 }
 0x9b1   : > { %3447 = vmatprep.subr.bf16.mxu1 %v3853_v6 }
 0x9b4   : > { %3449 = vmatpush3.bf16.msra.mxu1 %v4402_v33 }
 0x9b5   : > { %3450 = vmatprep.subr.bf16.mxu1 %v3853_v6 }
 0x9b8   : > { %3452 = vmatpush3.bf16.msra.mxu1 %v4406_v37 }
 0x9b9   : > { %3453 = vmatprep.subr.bf16.mxu1 %v3853_v6 }
 0x9bc   : > { %3455 = vmatpush3.bf16.msra.mxu1 %v4410_v17 }
 0x9bd   : > { %3480 = vmatprep.subr.bf16.mxu1 %v3853_v6 }
 0xa72   : > { %v1581_v22 = vpop.f32.mrb[18].mxu1 }
 0xa73   : > { %v1585_v24 = vadd.f32 %v1581_v22, %v1236_v9  ;;  %v2915_v26 = vpop.f32.mrb[19].mxu1 }
 0xa75   : > { %3617 = vtanh.f32 %v1585_v24 }
 0xa7f   : > { %v3618_v27 = vpop.eup %3617 }
 0xa80   : > { %v1588_v31 = vadd.f32 %v3618_v27, %v4370_v14  ;;  %2949 = vmatmul.mubr.f32.vlgmr.msra.gmra.mrb[20].mxu0 %v3618_v27  ;;  %v1241_v14 = vadd.f32 %v4477_v62, %v4444_v46 }
 0xa81   : > { %3458 = vmatpush3.bf16.msra.mxu0 %v4382_v18  ;;  %3018 = vmatprep.mubr.msk.f32.mxu0 %vm3854_vm0, %v3855_v10 }
 0xa82   : > { %1906 = vst [vmem:[%s4119_s29 + $0x18] sm:$0xff] %v1588_v31  ;;  %3459 = vmatprep.subr.bf16.mxu0 %v3853_v6 }
 0xa85   : > { %3461 = vmatpush3.bf16.msra.mxu0 %v4386_v57 }
 0xa86   : > { %3462 = vmatprep.subr.bf16.mxu0 %v3853_v6 }
 0xa89   : > { %3464 = vmatpush3.bf16.msra.mxu0 %v4390_v58 }
 0xa8a   : > { %3465 = vmatprep.subr.bf16.mxu0 %v3853_v6 }
 0xa8d   : > { %3467 = vmatpush3.bf16.msra.mxu0 %v4394_v25 }
 0xa8e   : > { %3468 = vmatprep.subr.bf16.mxu0 %v3853_v6 }
 0xa91   : > { %3470 = vmatpush3.bf16.msra.mxu0 %v4398_v28 }
 0xa92   : > { %3471 = vmatprep.subr.bf16.mxu0 %v3853_v6 }
 0xa95   : > { %3473 = vmatpush3.bf16.msra.mxu0 %v4402_v33 }
 0xa96   : > { %3474 = vmatprep.subr.bf16.mxu0 %v3853_v6 }
 0xa99   : > { %3476 = vmatpush3.bf16.msra.mxu0 %v4406_v37 }
 0xa9a   : > { %3477 = vmatprep.subr.bf16.mxu0 %v3853_v6 }
 0xa9d   : > { %3479 = vmatpush3.bf16.msra.mxu0 %v4410_v17 }
 0xb53   : > { %v1657_v32 = vpop.f32.mrb[20].mxu0 }
 0xb54   : > { %v1661_v34 = vadd.f32 %v1657_v32, %v1241_v14  ;;  %v2950_v35 = vpop.f32.mrb[21].mxu0 }
 0xb56   : > { %3619 = vtanh.f32 %v1661_v34 }
 0xb60   : > { %v3620_v38 = vpop.eup %3619 }
 0xb61   : > { %v1664_v11 = vadd.f32 %v3620_v38, %v4374_v15  ;;  %2984 = vmatmul.mubr.f32.vlgmr.msra.gmra.mrb[20].mxu1 %v3620_v38 }
 0xb62   : > { %3482 = vmatpush3.bf16.msra.mxu1 %v4382_v18  ;;  %3053 = vmatprep.mubr.msk.f32.mxu1 %vm3854_vm0, %v3855_v10  ;;  %v1246_v10 = vadd.f32 %v4441_v44, %v4477_v62 }
 0xb63   : > { %1907 = vst [vmem:[%s4119_s29 + $0x20] sm:$0xff] %v1664_v11  ;;  %3483 = vmatprep.subr.bf16.mxu1 %v3853_v6 }
 0xb66   : > { %3485 = vmatpush3.bf16.msra.mxu1 %v4386_v57 }
 0xb67   : > { %3486 = vmatprep.subr.bf16.mxu1 %v3853_v6 }
 0xb6a   : > { %3488 = vmatpush3.bf16.msra.mxu1 %v4390_v58 }
 0xb6b   : > { %3489 = vmatprep.subr.bf16.mxu1 %v3853_v6 }
 0xb6e   : > { %3491 = vmatpush3.bf16.msra.mxu1 %v4394_v25 }
 0xb6f   : > { %3492 = vmatprep.subr.bf16.mxu1 %v3853_v6 }
 0xb72   : > { %3494 = vmatpush3.bf16.msra.mxu1 %v4398_v28  ;;  %v1251_v28 = vadd.f32 %v4477_v62, %v4502_v1 }
 0xb73   : > { %3495 = vmatprep.subr.bf16.mxu1 %v3853_v6 }
 0xb76   : > { %3497 = vmatpush3.bf16.msra.mxu1 %v4402_v33 }
 0xb77   : > { %3498 = vmatprep.subr.bf16.mxu1 %v3853_v6 }
 0xb7a   : > { %3500 = vmatpush3.bf16.msra.mxu1 %v4406_v37 }
 0xb7b   : > { %3501 = vmatprep.subr.bf16.mxu1 %v3853_v6 }
 0xb7e   : > { %3503 = vmatpush3.bf16.msra.mxu1 %v4410_v17 }
 0xc34   : > { %v1733_v15 = vpop.f32.mrb[20].mxu1 }
 0xc35   : > { %v1737_v18 = vadd.f32 %v1733_v15, %v1246_v10  ;;  %v2985_v57 = vpop.f32.mrb[21].mxu1 }
 0xc37   : > { %3621 = vtanh.f32 %v1737_v18 }
 0xc41   : > { %v3622_v58 = vpop.eup %3621 }
 0xc42   : > { %v1740_v25 = vadd.f32 %v3622_v58, %v4379_v53  ;;  %3019 = vmatmul.mubr.f32.vlgmr.msra.gmra.mrb[22].mxu0 %v3622_v58 }
 0xc44   : > { %1908 = vst [vmem:[%s4119_s29 + $0x28] sm:$0xff] %v1740_v25 }
 0xd15   : > { %v1809_v33 = vpop.f32.mrb[22].mxu0 }
 0xd16   : > { %v1813_v6 = vadd.f32 %v1809_v33, %v1251_v28  ;;  %v3020_v37 = vpop.f32.mrb[23].mxu0 }
 0xd18   : > { %3623 = vtanh.f32 %v1813_v6 }
 0xd22   : > { %v3624_v17 = vpop.eup %3623 }
 0xd23   : > { %v1816_v23 = vadd.f32 %v3624_v17, %v4417_v41  ;;  %3054 = vmatmul.mubr.f32.vlgmr.msra.gmra.mrb[22].mxu1 %v3624_v17 }
 0xd25   : > { %1909 = vst [vmem:[%s4119_s29 + $0x30] sm:$0xff] %v1816_v23 }
 0xdf6   : > { %v1885_v36 = vpop.f32.mrb[22].mxu1 }
 0xdf7   : > { %v1889_v53 = vadd.f32 %v1885_v36, %v1256_v30  ;;  %v3055_v39 = vpop.f32.mrb[23].mxu1 }
 0xdf9   : > { %3625 = vtanh.f32 %v1889_v53 }
 0xe00   : > { %1914 = sbr.rel (%p2078_p11) target bundleno = 3597 (0xe0d), region = 64 }
 0xe03   : > { %v3626_v40 = vpop.eup %3625 }
 0xe04   : > { %v1892_v59 = vadd.f32 %v3626_v40, %v4469_v54  ;;  %1894 = vst [vmem:[#allocation2 + $0x8] sm:$0xff] %v3626_v40 }
 0xe06   : > { %1910 = vst [vmem:[%s4119_s29 + $0x38] sm:$0xff] %v1892_v59 }
 0xe0b   : > { %v1916_v42 = vld [vmem:[#allocation2 + $0x8] sm:$0xff] }
 0xe0c   : > { %1918 = vst [vmem:[#allocation14 + $0x8] sm:$0xff] %v1916_v42 }
 0xe0d PF: > { %s2087_s10 = sshll.u32 %s3916_s25, 10  ;;  %s1933_s12 = sshll.u32 %s4119_s29, 4  ;;  %s4610_s12 = int_to_ptr.vmem [resolvable:$true] %s1933_s12 }
 0xe0e   : > { %s4607_s17 = scalar_lea.hbm %s4681_s5, %s2087_s10  ;;  %s1920_s20 = scalar_lea.sflag [#allocation7], %s4101_s13 }
 0xe0f   : > { %s3741_s19 = scalar_lea.vmem %s4610_s12, 1024  ;;  %s3856_s7 = smov [#allocation13]  }
 0xe10   : > { %p3742_p7 = scmp.ne.s32.totalorder %s4610_s12, %s3741_s19  ;;  %s3745_s16 = sshll.u32 %s3856_s7, 4  ;;  %s3746_s16 = int_to_ptr.vmem [resolvable:$false] %s3745_s16 }
 0xe11   : > { %s3747_s27 = scalar_lea.vmem %s3746_s16, 2048  ;;  %p3748_p2 = scmp.lt.s32.totalorder %s4610_s12, %s3746_s16 }
 0xe12   : > { %p3743_p13 = pnand %p3742_p7, %p4050_p5  ;;  %p3749_p4 = scmp.lt.s32.totalorder %s3747_s27, %s3741_s19 }
 0xe14   : > { %p3744_p1 = pneg %p3743_p13  ;;  %p3750_p10 = por %p3749_p4, %p3748_p2 }
 0xe16   : > { %p3751_p3 = pnand %p3750_p10, %p3744_p1 }
 0xe18   : > { %3754 = shalt.err (!%p3751_p3)
}
 0xe19   : > { %s3755_s29 = scalar_lea.hbm %s4607_s17, 1024  ;;  %s3759_s26 = scalar_lea.hbm %s4681_s5, 2048 }
 0xe1a   : > { %p3756_p12 = scmp.ne.s32.totalorder %s4607_s17, %s3755_s29  ;;  %p3760_p6 = scmp.lt.u32.totalorder %s4607_s17, %s4681_s5 }
 0xe1b   : > { %p3761_p8 = scmp.lt.u32.totalorder %s3759_s26, %s3755_s29  ;;  %p3763_p7 = scmp.lt.u32.totalorder %s3755_s29, %s4607_s17 }
 0xe1c   : > { %p3757_p9 = pnand %p3756_p12, %p4050_p5 }
 0xe1d   : > { %p3762_p11 = por %p3761_p8, %p3760_p6 }
 0xe1e   : > { %p3758_p0 = pneg %p3757_p9 }
 0xe1f   : > { %p3764_p13 = por %p3763_p7, %p3762_p11 }
 0xe21   : > { %p3765_p1 = pnand %p3764_p13, %p3758_p0 }
 0xe23   : > { %3768 = shalt.err (!%p3765_p1)
}
 0xe24   : > { %s3857_s8 = smov 128   ;;  %s3858_s19 = smov 8  }
 0xe25   : > { %3518 = dma.vmem_to_hbm [thread:$0]  (%p4050_p5), %s4610_s12, 1024, %s4607_s17, %s1920_s20, %s3857_s8, %s3857_s8, %s3858_s19  }
 0xe26   : > { %s3859_s7 = smov [#allocation14]   ;;  %p4701_p4 = scmp.eq.s32.totalorder %s3916_s25, 1 }
 0xe27   : > { %s1946_s16 = sshll.u32 %s3859_s7, 4  ;;  %s1947_s16 = int_to_ptr.vmem [resolvable:$true] %s1946_s16 }
 0xe28   : > { %s3769_s27 = scalar_lea.vmem %s1947_s16, 256  ;;  %p3776_p12 = scmp.lt.s32.totalorder %s1947_s16, %s1947_s16 }
 0xe29   : > { %p3770_p2 = scmp.ne.s32.totalorder %s1947_s16, %s3769_s27  ;;  %p3777_p9 = scmp.lt.s32.totalorder %s3769_s27, %s3769_s27 }
 0xe2b   : > { %p3771_p10 = pnand %p3770_p2, %p4701_p4  ;;  %p3778_p0 = por %p3777_p9, %p3776_p12 }
 0xe2d   : > { %p3772_p3 = pneg %p3771_p10 }
 0xe2f   : > { %p3779_p6 = pnand %p3778_p0, %p3772_p3 }
 0xe31   : > { %3782 = shalt.err (!%p3779_p6)
}
 0xe32   : > { %s3783_s15 = scalar_lea.hbm %s4682_s6, 256  ;;  %p4702_p8 = pmov %p4701_p4 }
 0xe33   : > { %p3784_p5 = scmp.ne.s32.totalorder %s4682_s6, %s3783_s15  ;;  %p3789_p13 = scmp.lt.u32.totalorder %s3783_s15, %s4682_s6 }
 0xe35   : > { %p3785_p11 = pnand %p3784_p5, %p4702_p8 }
 0xe37   : > { %p3786_p7 = pneg %p3785_p11 }
 0xe39   : > { %p3791_p1 = pnand %p3789_p13, %p3786_p7 }
 0xe3b   : > { %3794 = shalt.err (!%p3791_p1)
}
 0xe3c   : > { %p4703_p2 = pmov %p4701_p4 }
 0xe3e   : > { %3520 = dma.vmem_to_hbm [thread:$0]  (%p4703_p2), %s1947_s16, 256, %s4682_s6, [#allocation15], %s3857_s8, %s3857_s8, %s3858_s19  }
 0xe3f   : > { %p4704_p4 = pmov %p4703_p2 }
 0xe40   : > { %p4705_p10 = pmov %p4703_p2 }
 0xe41   : > { %3824 = dma.done.wait (%p4704_p4), [#allocation15], 256  }
 0xe42   : > { %3826 = vsyncadd (%p4705_p10), [#allocation15], 4294967040 }
 0xe43 PF: > { %s1965_s10 = sand.u32 1, %s3833_s21   ;;  %p4706_p3 = scmp.ne.s32.totalorder %s4687_s28, 0 }
 0xe44   : > { %p4707_p12 = scmp.ge.s32.totalorder %s3845_s24, 2  ;;  %s1966_s11 = scalar_lea.sflag [#allocation7], %s1965_s10 }
 0xe46   : > { %p3539_p9 = pnand %p4707_p12, %p4706_p3 }
 0xe48   : > { %3828 = dma.done.wait (!%p3539_p9), %s1966_s11, 1024  }
 0xe49   : > { %3830 = vsyncadd (!%p3539_p9), %s1966_s11, 4294966272  ;;  %p23_p0 = scmp.ge.s32.totalorder %s4036_s18, 4   ;;  %s4708_s21 = smov %s3837_s22 }
 0xe4a   : > { %s4709_s22 = smov %s3841_s23  ;;  %s4710_s23 = smov %s4046_s14 }
 0xe4b   : > { %s4711_s24 = smov %s4036_s18  ;;  %25 = sbr.rel (!%p23_p0) target bundleno = 8 (0x8), region = 131 }
 0xe52   :  { %1971 = vsyncpa [#allocation6], 1 }
 0xe53   :  { %1973 = vsyncpa [#allocation6 + $0x1], 1 }
 0xe54   :  { %1974 = vsyncpa [#allocation9], 1 }
 0xe55   :  { %1975 = vsyncpa [#allocation12], 1 }
 0xe56   :  { %1976 = vsyncpa [#allocation7], 1 }
 0xe57   :  { %1978 = vsyncpa [#allocation7 + $0x1], 1 }
 0xe58   :  { %1979 = vsyncpa [#allocation15], 1 }

</bundles_post_ra>
